<compile_context>
chip_gen: v7x
topology: tpu7x:2x2x1
jax: 0.10.0
libtpu: 0.0.40
codegen_flags: <defaults>
</compile_context>

<pallas_src>
import math
import numpy as np

import jax
import jax.numpy as jnp
from jax import lax
from jax.experimental import pallas as pl
from jax.experimental.pallas import tpu as pltpu

# ---------------- config (small, consistent with the module) ----------------
B, S, D, H = 2, 8, 64, 4          # batch, seqlen, dim, n_heads
HD = D // H                        # head_dim = 16
MULTIPLE_OF = 32
NORM_EPS = 1e-5
HIDDEN = MULTIPLE_OF * ((int(2 * (4 * D) / 3) + MULTIPLE_OF - 1) // MULTIPLE_OF)  # 192
HP = 256                           # per-batch FFN hidden zero-padded to lane-aligned (exact)

BD = B * D                         # 128 packed lanes (batch folded into lanes)
BH = B * H                         # 8 (batch, head) blocks
BHS = BH * S                       # 64 score columns

# f32 constant slab layout (width BD = 128, row starts sublane-aligned)
ROW_ANW, ROW_FNW, ROW_BFD, ROW_BSEL = 0, 8, 16, 24
ROW_AMASK, ROW_COS, ROW_SINA, ROW_SINB = 32, 40, 48, 56
CMAT_ROWS = 64

# bf16 wide weight slab columns: [ QKV | per-head Linear | Wo | W1|W3 ]
WA_COLS = 5 * BD + 2 * B * HP      # 1664
# bf16 tall weight slab rows:   [ value mask ; W2 ]
WB_ROWS = BHS + B * HP             # 576


# ------------------------------- kernel -------------------------------------
def transformer_block_kernel(x_ref, cmat_ref, wA_ref, wB_ref, out_ref):
    f32, bf16 = jnp.float32, jnp.bfloat16

    x = x_ref[...]                                           # (S, BD) f32, lane-dense

    anw = cmat_ref[ROW_ANW:ROW_ANW + 1, :]                   # (1, BD)
    fnw = cmat_ref[ROW_FNW:ROW_FNW + 1, :]
    bfd = cmat_ref[ROW_BFD:ROW_BFD + 1, :]
    bsel = cmat_ref[ROW_BSEL:ROW_BSEL + 1, :]                # 1.0 on batch-0 lanes
    amask = cmat_ref[ROW_AMASK:ROW_AMASK + S, 0:BHS]         # (S, BHS) causal additive mask
    cosw = cmat_ref[ROW_COS:ROW_COS + S, :]                  # (S, BD) RoPE constants
    sina = cmat_ref[ROW_SINA:ROW_SINA + S, :]
    sinb = cmat_ref[ROW_SINB:ROW_SINB + S, :]

    # ---- per-batch RMSNorm (exact f32: one full-row sum + one masked sum) ----
    def rms_norm(t, w):
        t2 = t * t
        s0 = jnp.sum(t2 * bsel, axis=-1, keepdims=True)      # batch-0 sum
        s1 = jnp.sum(t2, axis=-1, keepdims=True) - s0        # batch-1 sum
        ms = (s0 * bsel + s1 * (1.0 - bsel)) * (1.0 / D)
        return t * lax.rsqrt(ms + NORM_EPS) * w

    xn = rms_norm(x, anw)

    # ---- fused QKV: (S,128) @ (128,384) bf16 operands, f32 accumulate ----
    qkv = jnp.dot(xn.astype(bf16), wA_ref[:, 0:3 * BD], preferred_element_type=f32)

    q = qkv[:, 0:BD]
    k = qkv[:, BD:2 * BD]
    v = qkv[:, 2 * BD:3 * BD]

    # ---- RoPE: pair swap on the XLU, pre-masked +/- sin coefficients ----
    def rope(t):
        return (t * cosw
                + pltpu.roll(t, BD - 1, axis=1) * sina       # lane+1 -> even lanes (-sin)
                + pltpu.roll(t, 1, axis=1) * sinb)           # lane-1 -> odd lanes  (+sin)

    q = rope(q)
    k = rope(k)

    # ---- block-diagonal K / V over the B*H (batch, head) blocks, bf16 ----
    vmask = wB_ref[0:BHS, :]                                 # (BHS, BD) bf16 0/1
    k_bf = k.astype(bf16)
    v_bf = v.astype(bf16)
    ktm = jnp.concatenate([k_bf] * BH, axis=0) * vmask       # (BHS, BD)
    vtm = jnp.concatenate([v_bf] * BH, axis=0) * vmask

    # ---- all-(batch,head) attention scores: contract last dim of both (no .T relayout) ----
    q_bf = (q * (1.0 / math.sqrt(HD))).astype(bf16)          # 1/sqrt(16)=0.25 exact
    s = lax.dot_general(q_bf, ktm, (((1,), (1,)), ((), ())),
                        preferred_element_type=f32)          # (S, BHS)
    s = s + amask
    # global per-row max is constant within every (batch,head) segment -> softmax unchanged
    s = s - jnp.max(s, axis=-1, keepdims=True)
    p = jnp.exp(s)
    p_bf = p.astype(bf16)

    o_un = jnp.dot(p_bf, vtm, preferred_element_type=f32)    # (S, BD)
    seg = jnp.dot(p_bf, vmask, preferred_element_type=f32)   # per-segment softmax denom
    o = o_un * pl.reciprocal(seg, approx=True)

    # ---- shared per-head Linear(head_dim)+SiLU (block-diag) + output projection ----
    y = jnp.dot(o.astype(bf16), wA_ref[:, 3 * BD:4 * BD], preferred_element_type=f32) + bfd
    y = y * jax.nn.sigmoid(y)                                # SiLU
    attn = jnp.dot(y.astype(bf16), wA_ref[:, 4 * BD:5 * BD], preferred_element_type=f32)
    h = x + attn

    # ---- FFN RMSNorm + SwiGLU (w1|w3 fused per batch, hidden zero-padded to HP) ----
    hn = rms_norm(h, fnw)
    gu = jnp.dot(hn.astype(bf16), wA_ref[:, 5 * BD:5 * BD + 2 * B * HP],
                 preferred_element_type=f32)                 # (S, 2*B*HP)
    g = gu[:, 0:B * HP]
    u = gu[:, B * HP:2 * B * HP]
    g = g * jax.nn.sigmoid(g)
    ff = jnp.dot((g * u).astype(bf16), wB_ref[BHS:BHS + B * HP, :],
                 preferred_element_type=f32)

    out_ref[...] = h + ff                                    # (S, BD) lane-dense store


# ------------------------------- wrapper -------------------------------------
def transformer_block(x, cmat, wA, wB):
    # pack batch into lanes: (B,S,D) -> (S, B*D); unpack after the call (layout plumbing only)
    xp = jnp.transpose(x, (1, 0, 2)).reshape(S, BD)
    args = (xp, cmat, wA, wB)
    in_specs = [pl.BlockSpec(a.shape, lambda i: (0, 0)) for a in args]
    outp = pl.pallas_call(
        transformer_block_kernel,
        out_shape=jax.ShapeDtypeStruct((S, BD), jnp.float32),
        grid_spec=pltpu.PrefetchScalarGridSpec(
            num_scalar_prefetch=0,
            grid=(1,),
            in_specs=in_specs,
            out_specs=pl.BlockSpec((S, BD), lambda i: (0, 0)),
        ),
        compiler_params=pltpu.CompilerParams(dimension_semantics=("arbitrary",)),
    )(*args)
    return jnp.transpose(outp.reshape(S, B, D), (1, 0, 2))


# ----------------------------- pure-JAX reference ----------------------------
def reference(x, anw, wq, wk, wv, cos, sin, mask, wf, bf, wo, fnw, w1, w3, w2):
    def rms(t, w):
        ms = jnp.mean(t * t, axis=-1, keepdims=True)
        return t * lax.rsqrt(ms + NORM_EPS) * w

    xn = rms(x, anw)
    q = (xn @ wq).reshape(B, S, H, HD)
    k = (xn @ wk).reshape(B, S, H, HD)
    v = (xn @ wv).reshape(B, S, H, HD)

    def rot(t):  # faithful to apply_rotary_emb (interleaved real/imag pairs)
        tr = t.reshape(B, S, H, HD // 2, 2)
        a, b = tr[..., 0], tr[..., 1]
        c = cos[None, :, None, :]
        s = sin[None, :, None, :]
        return jnp.stack([a * c - b * s, a * s + b * c], axis=-1).reshape(B, S, H, HD)

    q, k = rot(q), rot(k)
    qt, kt, vt = (t.transpose(0, 2, 1, 3) for t in (q, k, v))       # (B,H,S,HD)
    scores = jnp.einsum("bhqd,bhkd->bhqk", qt, kt) / math.sqrt(HD) + mask[None, None]
    p = jax.nn.softmax(scores, axis=-1)
    o = jnp.einsum("bhqk,bhkd->bhqd", p, vt)                        # (B,H,S,HD)
    y = jax.nn.silu(o @ wf + bf)                                    # shared per-head FFN
    attn = (y.transpose(0, 2, 1, 3).reshape(B, S, D)) @ wo
    h = x + attn
    hn = rms(h, fnw)
    ff = (jax.nn.silu(hn @ w1) * (hn @ w3)) @ w2
    return h + ff


# --------------------------------- main ---------------------------------------
if __name__ == "__main__":
    key = jax.random.PRNGKey(0)
    ks = jax.random.split(key, 16)

    x = jax.random.normal(ks[0], (B, S, D), jnp.float32)

    scale = 0.05
    wq = jax.random.normal(ks[1], (D, D), jnp.float32) * scale
    wk = jax.random.normal(ks[2], (D, D), jnp.float32) * scale
    wv = jax.random.normal(ks[3], (D, D), jnp.float32) * scale
    wo = jax.random.normal(ks[4], (D, D), jnp.float32) * scale
    wf = jax.random.normal(ks[5], (HD, HD), jnp.float32) * scale
    bf = jax.random.normal(ks[6], (HD,), jnp.float32) * scale
    w1 = jax.random.normal(ks[7], (D, HIDDEN), jnp.float32) * scale
    w3 = jax.random.normal(ks[8], (D, HIDDEN), jnp.float32) * scale
    w2 = jax.random.normal(ks[9], (HIDDEN, D), jnp.float32) * scale
    anw = 1.0 + 0.1 * jax.random.normal(ks[10], (D,), jnp.float32)   # RMSNorm weights
    fnw = 1.0 + 0.1 * jax.random.normal(ks[11], (D,), jnp.float32)

    # rotary frequencies (precompute_freqs_cis, theta=10000)
    inv_freq = 1.0 / (10000.0 ** (jnp.arange(0, HD, 2, dtype=jnp.float32) / HD))
    t = jnp.arange(S, dtype=jnp.float32)
    freqs = jnp.outer(t, inv_freq)                                   # (S, HD//2)
    cos, sin = jnp.cos(freqs), jnp.sin(freqs)

    # ---- host-side constant packing (numpy) ----
    wq_np, wk_np, wv_np, wo_np = (np.asarray(a) for a in (wq, wk, wv, wo))
    wf_np, bf_np = np.asarray(wf), np.asarray(bf)
    w1_np, w3_np, w2_np = np.asarray(w1), np.asarray(w3), np.asarray(w2)
    anw_np, fnw_np = np.asarray(anw), np.asarray(fnw)
    cos_np, sin_np = np.asarray(cos), np.asarray(sin)

    # f32 constant slab: norm weights / bias / batch-lane mask / causal mask / RoPE consts
    cmat_np = np.zeros((CMAT_ROWS, BD), np.float32)
    cmat_np[ROW_ANW, :] = np.tile(anw_np, B)
    cmat_np[ROW_FNW, :] = np.tile(fnw_np, B)
    cmat_np[ROW_BFD, :] = np.tile(bf_np, BH)
    cmat_np[ROW_BSEL, 0:D] = 1.0
    causal = np.where(np.arange(S)[None, :] <= np.arange(S)[:, None], 0.0, -1e9)
    cmat_np[ROW_AMASK:ROW_AMASK + S, 0:BHS] = np.tile(causal, (1, BH)).astype(np.float32)
    cos_hd = np.repeat(cos_np, 2, axis=-1)                           # (S, HD)
    sin_hd = np.repeat(sin_np, 2, axis=-1)
    even = (np.arange(BD) % 2 == 0).astype(np.float32)[None, :]
    cmat_np[ROW_COS:ROW_COS + S, :] = np.tile(cos_hd, (1, BH))
    cmat_np[ROW_SINA:ROW_SINA + S, :] = np.tile(sin_hd, (1, BH)) * (-even)
    cmat_np[ROW_SINB:ROW_SINB + S, :] = np.tile(sin_hd, (1, BH)) * (1.0 - even)

    # bf16 wide weight slab (128, 1664): [QKV | per-head Linear | Wo | W1|W3] block-diagonals
    wA_np = np.zeros((BD, WA_COLS), np.float32)
    for b in range(B):
        r0 = b * D
        wA_np[r0:r0 + D, b * D:(b + 1) * D] = wq_np
        wA_np[r0:r0 + D, BD + b * D:BD + (b + 1) * D] = wk_np
        wA_np[r0:r0 + D, 2 * BD + b * D:2 * BD + (b + 1) * D] = wv_np
        wA_np[r0:r0 + D, 4 * BD + b * D:4 * BD + (b + 1) * D] = wo_np
        wA_np[r0:r0 + D, 5 * BD + b * HP:5 * BD + b * HP + HIDDEN] = w1_np
        wA_np[r0:r0 + D, 5 * BD + B * HP + b * HP:5 * BD + B * HP + b * HP + HIDDEN] = w3_np
        for hh in range(H):
            o0 = b * D + hh * HD
            wA_np[o0:o0 + HD, 3 * BD + o0:3 * BD + o0 + HD] = wf_np

    # bf16 tall weight slab (576, 128): [per-(batch,head) value mask ; W2 block-diag]
    wB_np = np.zeros((WB_ROWS, BD), np.float32)
    for b in range(B):
        for hh in range(H):
            j = b * H + hh
            wB_np[j * S:(j + 1) * S, b * D + hh * HD:b * D + (hh + 1) * HD] = 1.0
        wB_np[BHS + b * HP:BHS + b * HP + HIDDEN, b * D:(b + 1) * D] = w2_np

    cmat = jnp.asarray(cmat_np)
    wA = jnp.asarray(wA_np, dtype=jnp.bfloat16)
    wB = jnp.asarray(wB_np, dtype=jnp.bfloat16)

    out = transformer_block(x, cmat, wA, wB)
    out = jax.block_until_ready(out)

    idx = jnp.arange(S)
    mask = jnp.where(idx[None, :] <= idx[:, None], 0.0, -1e9).astype(jnp.float32)
    ref = reference(x, anw, wq, wk, wv, cos, sin, mask, wf, bf, wo, fnw, w1, w3, w2)
    # bf16 MXU operands with f32 accumulation -> relaxed (but structural-bug-catching) tolerance
    np.testing.assert_allclose(np.asarray(out), np.asarray(ref), rtol=2e-2, atol=2e-2)

    print("KERNEL_OK")
</pallas_src>

<mosaic_0001>
module attributes {stable_mosaic.version = 11 : i64} {
  func.func @transformer_block_kernel(%arg0: i32, %arg1: memref<8x128xf32, #tpu.memory_space<vmem>>, %arg2: memref<64x128xf32, #tpu.memory_space<vmem>>, %arg3: memref<128x1664xbf16, #tpu.memory_space<vmem>>, %arg4: memref<576x128xbf16, #tpu.memory_space<vmem>>, %arg5: memref<8x128xf32, #tpu.memory_space<vmem>>) attributes {dimension_semantics = [#tpu.dimension_semantics<arbitrary>], iteration_bounds = array<i64: 1>, scalar_prefetch = 0 : i64, scratch_operands = 0 : i64, tpu.core_type = #tpu.core_type<tc>, window_params = [{pipeline_mode = #tpu.pipeline_mode<synchronous>, transform_indices = @transform_0, window_bounds = array<i64: 8, 128>}, {pipeline_mode = #tpu.pipeline_mode<synchronous>, transform_indices = @transform_1, window_bounds = array<i64: 64, 128>}, {pipeline_mode = #tpu.pipeline_mode<synchronous>, transform_indices = @transform_2, window_bounds = array<i64: 128, 1664>}, {pipeline_mode = #tpu.pipeline_mode<synchronous>, transform_indices = @transform_3, window_bounds = array<i64: 576, 128>}, {pipeline_mode = #tpu.pipeline_mode<synchronous>, transform_indices = @transform_4, window_bounds = array<i64: 8, 128>}]} {
    %c0 = arith.constant 0 : index
    %c0_0 = arith.constant 0 : index
    %0 = vector.load %arg1[%c0, %c0_0] : memref<8x128xf32, #tpu.memory_space<vmem>>, vector<8x128xf32>
    %c0_1 = arith.constant 0 : index
    %c0_2 = arith.constant 0 : index
    %1 = vector.load %arg2[%c0_1, %c0_2] : memref<64x128xf32, #tpu.memory_space<vmem>>, vector<1x128xf32>
    %c8 = arith.constant 8 : index
    %c0_3 = arith.constant 0 : index
    %2 = vector.load %arg2[%c8, %c0_3] : memref<64x128xf32, #tpu.memory_space<vmem>>, vector<1x128xf32>
    %c16 = arith.constant 16 : index
    %c0_4 = arith.constant 0 : index
    %3 = vector.load %arg2[%c16, %c0_4] : memref<64x128xf32, #tpu.memory_space<vmem>>, vector<1x128xf32>
    %c24 = arith.constant 24 : index
    %c0_5 = arith.constant 0 : index
    %4 = vector.load %arg2[%c24, %c0_5] : memref<64x128xf32, #tpu.memory_space<vmem>>, vector<1x128xf32>
    %c32 = arith.constant 32 : index
    %c0_6 = arith.constant 0 : index
    %5 = vector.load %arg2[%c32, %c0_6] : memref<64x128xf32, #tpu.memory_space<vmem>>, vector<8x64xf32>
    %c40 = arith.constant 40 : index
    %c0_7 = arith.constant 0 : index
    %6 = vector.load %arg2[%c40, %c0_7] : memref<64x128xf32, #tpu.memory_space<vmem>>, vector<8x128xf32>
    %c48 = arith.constant 48 : index
    %c0_8 = arith.constant 0 : index
    %7 = vector.load %arg2[%c48, %c0_8] : memref<64x128xf32, #tpu.memory_space<vmem>>, vector<8x128xf32>
    %c56 = arith.constant 56 : index
    %c0_9 = arith.constant 0 : index
    %8 = vector.load %arg2[%c56, %c0_9] : memref<64x128xf32, #tpu.memory_space<vmem>>, vector<8x128xf32>
    %9 = arith.mulf %0, %0 : vector<8x128xf32>
    %10 = vector.broadcast %4 : vector<1x128xf32> to vector<8x128xf32>
    %11 = arith.mulf %9, %10 : vector<8x128xf32>
    %cst = arith.constant dense<0.000000e+00> : vector<8xf32>
    %12 = vector.multi_reduction <add>, %11, %cst [1] : vector<8x128xf32> to vector<8xf32>
    %13 = vector.shape_cast %12 : vector<8xf32> to vector<8x1xf32>
    %cst_10 = arith.constant dense<0.000000e+00> : vector<8xf32>
    %14 = vector.multi_reduction <add>, %9, %cst_10 [1] : vector<8x128xf32> to vector<8xf32>
    %15 = vector.shape_cast %14 : vector<8xf32> to vector<8x1xf32>
    %16 = arith.subf %15, %13 : vector<8x1xf32>
    %17 = vector.broadcast %13 : vector<8x1xf32> to vector<8x128xf32>
    %18 = vector.broadcast %4 : vector<1x128xf32> to vector<8x128xf32>
    %19 = arith.mulf %17, %18 : vector<8x128xf32>
    %cst_11 = arith.constant 1.000000e+00 : f32
    %20 = vector.broadcast %cst_11 : f32 to vector<1x128xf32>
    %21 = arith.subf %20, %4 : vector<1x128xf32>
    %22 = vector.broadcast %16 : vector<8x1xf32> to vector<8x128xf32>
    %23 = vector.broadcast %21 : vector<1x128xf32> to vector<8x128xf32>
    %24 = arith.mulf %22, %23 : vector<8x128xf32>
    %25 = arith.addf %19, %24 : vector<8x128xf32>
    %cst_12 = arith.constant 1.562500e-02 : f32
    %26 = vector.broadcast %cst_12 : f32 to vector<8x128xf32>
    %27 = arith.mulf %25, %26 : vector<8x128xf32>
    %cst_13 = arith.constant 9.99999974E-6 : f32
    %28 = vector.broadcast %cst_13 : f32 to vector<8x128xf32>
    %29 = arith.addf %27, %28 : vector<8x128xf32>
    %30 = math.rsqrt %29 : vector<8x128xf32>
    %31 = arith.mulf %0, %30 : vector<8x128xf32>
    %32 = vector.broadcast %1 : vector<1x128xf32> to vector<8x128xf32>
    %33 = arith.mulf %31, %32 : vector<8x128xf32>
    %34 = arith.truncf %33 : vector<8x128xf32> to vector<8x128xbf16>
    %c0_14 = arith.constant 0 : index
    %c0_15 = arith.constant 0 : index
    %35 = vector.load %arg3[%c0_14, %c0_15] : memref<128x1664xbf16, #tpu.memory_space<vmem>>, vector<128x384xbf16>
    %cst_16 = arith.constant dense<0.000000e+00> : vector<8x384xf32>
    %36 = tpu.matmul %34, %35, %cst_16 {dimension_numbers = #tpu.dot_dimension_numbers<[1], [0], [0], [1], [0, 0, 1, 1], [], []>} : vector<8x128xbf16>, vector<128x384xbf16>, vector<8x384xf32> -> vector<8x384xf32>
    %37 = vector.extract_strided_slice %36 {offsets = [0, 0], sizes = [8, 128], strides = [1, 1]} : vector<8x384xf32> to vector<8x128xf32>
    %38 = vector.extract_strided_slice %36 {offsets = [0, 128], sizes = [8, 128], strides = [1, 1]} : vector<8x384xf32> to vector<8x128xf32>
    %39 = vector.extract_strided_slice %36 {offsets = [0, 256], sizes = [8, 128], strides = [1, 1]} : vector<8x384xf32> to vector<8x128xf32>
    %40 = arith.mulf %37, %6 : vector<8x128xf32>
    %c127_i32 = arith.constant 127 : i32
    %41 = tpu.dynamic_rotate %37 by %c127_i32 dim 1 : vector<8x128xf32>, i32 -> vector<8x128xf32>
    %42 = arith.mulf %41, %7 : vector<8x128xf32>
    %43 = arith.addf %40, %42 : vector<8x128xf32>
    %c1_i32 = arith.constant 1 : i32
    %44 = tpu.dynamic_rotate %37 by %c1_i32 dim 1 : vector<8x128xf32>, i32 -> vector<8x128xf32>
    %45 = arith.mulf %44, %8 : vector<8x128xf32>
    %46 = arith.addf %43, %45 : vector<8x128xf32>
    %47 = arith.mulf %38, %6 : vector<8x128xf32>
    %c127_i32_17 = arith.constant 127 : i32
    %48 = tpu.dynamic_rotate %38 by %c127_i32_17 dim 1 : vector<8x128xf32>, i32 -> vector<8x128xf32>
    %49 = arith.mulf %48, %7 : vector<8x128xf32>
    %50 = arith.addf %47, %49 : vector<8x128xf32>
    %c1_i32_18 = arith.constant 1 : i32
    %51 = tpu.dynamic_rotate %38 by %c1_i32_18 dim 1 : vector<8x128xf32>, i32 -> vector<8x128xf32>
    %52 = arith.mulf %51, %8 : vector<8x128xf32>
    %53 = arith.addf %50, %52 : vector<8x128xf32>
    %c0_19 = arith.constant 0 : index
    %c0_20 = arith.constant 0 : index
    %54 = vector.load %arg4[%c0_19, %c0_20] : memref<576x128xbf16, #tpu.memory_space<vmem>>, vector<64x128xbf16>
    %55 = arith.truncf %53 : vector<8x128xf32> to vector<8x128xbf16>
    %56 = arith.truncf %39 : vector<8x128xf32> to vector<8x128xbf16>
    %57 = tpu.concatenate %55, %55, %55, %55, %55, %55, %55, %55 in 0 : vector<8x128xbf16>, vector<8x128xbf16>, vector<8x128xbf16>, vector<8x128xbf16>, vector<8x128xbf16>, vector<8x128xbf16>, vector<8x128xbf16>, vector<8x128xbf16> -> vector<64x128xbf16>
    %58 = arith.mulf %57, %54 : vector<64x128xbf16>
    %59 = tpu.concatenate %56, %56, %56, %56, %56, %56, %56, %56 in 0 : vector<8x128xbf16>, vector<8x128xbf16>, vector<8x128xbf16>, vector<8x128xbf16>, vector<8x128xbf16>, vector<8x128xbf16>, vector<8x128xbf16>, vector<8x128xbf16> -> vector<64x128xbf16>
    %60 = arith.mulf %59, %54 : vector<64x128xbf16>
    %cst_21 = arith.constant 2.500000e-01 : f32
    %61 = vector.broadcast %cst_21 : f32 to vector<8x128xf32>
    %62 = arith.mulf %46, %61 : vector<8x128xf32>
    %63 = arith.truncf %62 : vector<8x128xf32> to vector<8x128xbf16>
    %cst_22 = arith.constant dense<0.000000e+00> : vector<8x64xf32>
    %64 = tpu.matmul %63, %58, %cst_22 {dimension_numbers = #tpu.dot_dimension_numbers<[1], [1], [0], [0], [0, 0, 1, 0], [], []>} : vector<8x128xbf16>, vector<64x128xbf16>, vector<8x64xf32> -> vector<8x64xf32>
    %65 = arith.addf %64, %5 : vector<8x64xf32>
    %cst_23 = arith.constant dense<0xFF800000> : vector<8xf32>
    %66 = vector.multi_reduction <maximumf>, %65, %cst_23 [1] : vector<8x64xf32> to vector<8xf32>
    %67 = vector.shape_cast %66 : vector<8xf32> to vector<8x1xf32>
    %68 = vector.broadcast %67 : vector<8x1xf32> to vector<8x64xf32>
    %69 = arith.subf %65, %68 : vector<8x64xf32>
    %70 = math.exp %69 : vector<8x64xf32>
    %71 = arith.truncf %70 : vector<8x64xf32> to vector<8x64xbf16>
    %cst_24 = arith.constant dense<0.000000e+00> : vector<8x128xf32>
    %72 = tpu.matmul %71, %60, %cst_24 {dimension_numbers = #tpu.dot_dimension_numbers<[1], [0], [0], [1], [0, 0, 1, 1], [], []>} : vector<8x64xbf16>, vector<64x128xbf16>, vector<8x128xf32> -> vector<8x128xf32>
    %cst_25 = arith.constant dense<0.000000e+00> : vector<8x128xf32>
    %73 = tpu.matmul %71, %54, %cst_25 {dimension_numbers = #tpu.dot_dimension_numbers<[1], [0], [0], [1], [0, 0, 1, 1], [], []>} : vector<8x64xbf16>, vector<64x128xbf16>, vector<8x128xf32> -> vector<8x128xf32>
    %74 = tpu.reciprocal %73 {approx = true} : vector<8x128xf32> -> vector<8x128xf32>
    %75 = arith.mulf %72, %74 : vector<8x128xf32>
    %76 = arith.truncf %75 : vector<8x128xf32> to vector<8x128xbf16>
    %c0_26 = arith.constant 0 : index
    %c384 = arith.constant 384 : index
    %77 = vector.load %arg3[%c0_26, %c384] : memref<128x1664xbf16, #tpu.memory_space<vmem>>, vector<128x128xbf16>
    %cst_27 = arith.constant dense<0.000000e+00> : vector<8x128xf32>
    %78 = tpu.matmul %76, %77, %cst_27 {dimension_numbers = #tpu.dot_dimension_numbers<[1], [0], [0], [1], [0, 0, 1, 1], [], []>} : vector<8x128xbf16>, vector<128x128xbf16>, vector<8x128xf32> -> vector<8x128xf32>
    %79 = vector.broadcast %3 : vector<1x128xf32> to vector<8x128xf32>
    %80 = arith.addf %78, %79 : vector<8x128xf32>
    %81 = arith.negf %80 : vector<8x128xf32>
    %82 = math.exp %81 : vector<8x128xf32>
    %cst_28 = arith.constant 1.000000e+00 : f32
    %83 = vector.broadcast %cst_28 : f32 to vector<8x128xf32>
    %84 = arith.addf %83, %82 : vector<8x128xf32>
    %85 = arith.divf %83, %84 : vector<8x128xf32>
    %86 = arith.mulf %80, %85 : vector<8x128xf32>
    %87 = arith.truncf %86 : vector<8x128xf32> to vector<8x128xbf16>
    %c0_29 = arith.constant 0 : index
    %c512 = arith.constant 512 : index
    %88 = vector.load %arg3[%c0_29, %c512] : memref<128x1664xbf16, #tpu.memory_space<vmem>>, vector<128x128xbf16>
    %cst_30 = arith.constant dense<0.000000e+00> : vector<8x128xf32>
    %89 = tpu.matmul %87, %88, %cst_30 {dimension_numbers = #tpu.dot_dimension_numbers<[1], [0], [0], [1], [0, 0, 1, 1], [], []>} : vector<8x128xbf16>, vector<128x128xbf16>, vector<8x128xf32> -> vector<8x128xf32>
    %90 = arith.addf %0, %89 : vector<8x128xf32>
    %91 = arith.mulf %90, %90 : vector<8x128xf32>
    %92 = vector.broadcast %4 : vector<1x128xf32> to vector<8x128xf32>
    %93 = arith.mulf %91, %92 : vector<8x128xf32>
    %cst_31 = arith.constant dense<0.000000e+00> : vector<8xf32>
    %94 = vector.multi_reduction <add>, %93, %cst_31 [1] : vector<8x128xf32> to vector<8xf32>
    %95 = vector.shape_cast %94 : vector<8xf32> to vector<8x1xf32>
    %cst_32 = arith.constant dense<0.000000e+00> : vector<8xf32>
    %96 = vector.multi_reduction <add>, %91, %cst_32 [1] : vector<8x128xf32> to vector<8xf32>
    %97 = vector.shape_cast %96 : vector<8xf32> to vector<8x1xf32>
    %98 = arith.subf %97, %95 : vector<8x1xf32>
    %99 = vector.broadcast %95 : vector<8x1xf32> to vector<8x128xf32>
    %100 = vector.broadcast %4 : vector<1x128xf32> to vector<8x128xf32>
    %101 = arith.mulf %99, %100 : vector<8x128xf32>
    %cst_33 = arith.constant 1.000000e+00 : f32
    %102 = vector.broadcast %cst_33 : f32 to vector<1x128xf32>
    %103 = arith.subf %102, %4 : vector<1x128xf32>
    %104 = vector.broadcast %98 : vector<8x1xf32> to vector<8x128xf32>
    %105 = vector.broadcast %103 : vector<1x128xf32> to vector<8x128xf32>
    %106 = arith.mulf %104, %105 : vector<8x128xf32>
    %107 = arith.addf %101, %106 : vector<8x128xf32>
    %cst_34 = arith.constant 1.562500e-02 : f32
    %108 = vector.broadcast %cst_34 : f32 to vector<8x128xf32>
    %109 = arith.mulf %107, %108 : vector<8x128xf32>
    %cst_35 = arith.constant 9.99999974E-6 : f32
    %110 = vector.broadcast %cst_35 : f32 to vector<8x128xf32>
    %111 = arith.addf %109, %110 : vector<8x128xf32>
    %112 = math.rsqrt %111 : vector<8x128xf32>
    %113 = arith.mulf %90, %112 : vector<8x128xf32>
    %114 = vector.broadcast %2 : vector<1x128xf32> to vector<8x128xf32>
    %115 = arith.mulf %113, %114 : vector<8x128xf32>
    %116 = arith.truncf %115 : vector<8x128xf32> to vector<8x128xbf16>
    %c0_36 = arith.constant 0 : index
    %c640 = arith.constant 640 : index
    %117 = vector.load %arg3[%c0_36, %c640] : memref<128x1664xbf16, #tpu.memory_space<vmem>>, vector<128x1024xbf16>
    %cst_37 = arith.constant dense<0.000000e+00> : vector<8x1024xf32>
    %118 = tpu.matmul %116, %117, %cst_37 {dimension_numbers = #tpu.dot_dimension_numbers<[1], [0], [0], [1], [0, 0, 1, 1], [], []>} : vector<8x128xbf16>, vector<128x1024xbf16>, vector<8x1024xf32> -> vector<8x1024xf32>
    %119 = vector.extract_strided_slice %118 {offsets = [0, 0], sizes = [8, 512], strides = [1, 1]} : vector<8x1024xf32> to vector<8x512xf32>
    %120 = vector.extract_strided_slice %118 {offsets = [0, 512], sizes = [8, 512], strides = [1, 1]} : vector<8x1024xf32> to vector<8x512xf32>
    %121 = arith.negf %119 : vector<8x512xf32>
    %122 = math.exp %121 : vector<8x512xf32>
    %cst_38 = arith.constant 1.000000e+00 : f32
    %123 = vector.broadcast %cst_38 : f32 to vector<8x512xf32>
    %124 = arith.addf %123, %122 : vector<8x512xf32>
    %125 = arith.divf %123, %124 : vector<8x512xf32>
    %126 = arith.mulf %119, %125 : vector<8x512xf32>
    %127 = arith.mulf %126, %120 : vector<8x512xf32>
    %128 = arith.truncf %127 : vector<8x512xf32> to vector<8x512xbf16>
    %c64 = arith.constant 64 : index
    %c0_39 = arith.constant 0 : index
    %129 = vector.load %arg4[%c64, %c0_39] : memref<576x128xbf16, #tpu.memory_space<vmem>>, vector<512x128xbf16>
    %cst_40 = arith.constant dense<0.000000e+00> : vector<8x128xf32>
    %130 = tpu.matmul %128, %129, %cst_40 {dimension_numbers = #tpu.dot_dimension_numbers<[1], [0], [0], [1], [0, 0, 1, 1], [], []>} : vector<8x512xbf16>, vector<512x128xbf16>, vector<8x128xf32> -> vector<8x128xf32>
    %131 = arith.addf %90, %130 : vector<8x128xf32>
    %c0_41 = arith.constant 0 : index
    %c0_42 = arith.constant 0 : index
    %132 = vector.load %arg5[%c0_41, %c0_42] : memref<8x128xf32, #tpu.memory_space<vmem>>, vector<8x128xf32>
    tpu.vector_store %arg5[%c0_41, %c0_42], %131 {strides = array<i32>} : memref<8x128xf32, #tpu.memory_space<vmem>>, vector<8x128xf32>,
    return
  }
  func.func @transform_0(%arg0: i32) -> (i32, i32) {
    %c0_i32 = arith.constant 0 : i32
    %c0_i32_0 = arith.constant 0 : i32
    %c0_i32_1 = arith.constant 0 : i32
    return %c0_i32, %c0_i32_0 : i32, i32
  }
  func.func @transform_1(%arg0: i32) -> (i32, i32) {
    %c0_i32 = arith.constant 0 : i32
    %c0_i32_0 = arith.constant 0 : i32
    %c0_i32_1 = arith.constant 0 : i32
    return %c0_i32, %c0_i32_0 : i32, i32
  }
  func.func @transform_2(%arg0: i32) -> (i32, i32) {
    %c0_i32 = arith.constant 0 : i32
    %c0_i32_0 = arith.constant 0 : i32
    %c0_i32_1 = arith.constant 0 : i32
    return %c0_i32, %c0_i32_0 : i32, i32
  }
  func.func @transform_3(%arg0: i32) -> (i32, i32) {
    %c0_i32 = arith.constant 0 : i32
    %c0_i32_0 = arith.constant 0 : i32
    %c0_i32_1 = arith.constant 0 : i32
    return %c0_i32, %c0_i32_0 : i32, i32
  }
  func.func @transform_4(%arg0: i32) -> (i32, i32) {
    %c0_i32 = arith.constant 0 : i32
    %c0_i32_0 = arith.constant 0 : i32
    %c0_i32_1 = arith.constant 0 : i32
    return %c0_i32, %c0_i32_0 : i32, i32
  }
}

</mosaic_0001>

<bundles_post_ra>
// kernel: tpu_custom_call.1
= control target key start
LH: loop header
LB: loop body
LE: loop exit
PB: predicated region body
PF: predicated region fallthrough
CT: control target
= control target key end

     0   :  { %9 = vsyncpa [#allocation3], 0  ;;  %s2621_s0 = inlined_call_operand.hbm [shape: f32[8,128], index: 0, kind: input, shape index: {}]   ;;  %s2622_s1 = inlined_call_operand.hbm [shape: f32[64,128], index: 1, kind: input, shape index: {}]   ;;  %s2623_s2 = inlined_call_operand.hbm [shape: bf16[128,1664], index: 2, kind: input, shape index: {}]   ;;  %s2624_s3 = inlined_call_operand.hbm [shape: bf16[576,128], index: 3, kind: input, shape index: {}]   ;;  %s2625_s4 = inlined_call_operand.hbm [shape: f32[8,128], index: 4, kind: output, shape index: {}]  }
   0x1   :  { %10 = vsyncpa [#allocation6], 0 }
   0x2   :  { %11 = vsyncpa [#allocation9], 0 }
   0x3   :  { %12 = vsyncpa [#allocation4], 0  ;;  %s2414_s15 = smov [#allocation5]   ;;  %s2296_s19 = scalar_lea.hbm %s2622_s1, 1024 }
   0x4   :  { %s28_s16 = sshll.u32 %s2414_s15, 4  ;;  %p2297_p0 = scmp.ne.s32.totalorder %s2622_s1, %s2296_s19  ;;  %s29_s16 = int_to_ptr.vmem [resolvable:$true] %s28_s16 }
   0x5   :  { %p2300_p1 = scmp.lt.u32.totalorder %s2296_s19, %s2622_s1 }
   0x7   :  { %p2302_p2 = pnand %p2300_p1, %p2297_p0 }
   0x9   :  { %2305 = shalt.err (!%p2302_p2)
}
   0xa   :  { %s2306_s24 = scalar_lea.vmem %s29_s16, 1024  ;;  %p2311_p4 = scmp.lt.s32.totalorder %s29_s16, %s29_s16 }
   0xb   :  { %p2307_p3 = scmp.ne.s32.totalorder %s29_s16, %s2306_s24  ;;  %p2312_p5 = scmp.lt.s32.totalorder %s2306_s24, %s2306_s24 }
   0xd   :  { %p2313_p6 = por %p2312_p5, %p2311_p4 }
   0xf   :  { %p2314_p7 = pnand %p2313_p6, %p2307_p3 }
  0x11   :  { %2317 = shalt.err (!%p2314_p7)
}
  0x12   :  { %s2415_s25 = smov 128   ;;  %s2416_s26 = smov 8  }
  0x13   :  { %34 = dma.hbm_to_vmem [thread:$0]  %s2622_s1, 1024, %s29_s16, [#allocation6], %s2415_s25, %s2415_s25, %s2416_s26  }
  0x14   :  { %s2417_s29 = smov [#allocation2]   ;;  %s2418_s5 = smov [#allocation7]  }
  0x15   :  { %s19_s30 = sshll.u32 %s2417_s29, 4  ;;  %s40_s6 = sshll.u32 %s2418_s5, 4  ;;  %s20_s30 = int_to_ptr.vmem [resolvable:$true] %s19_s30  ;;  %s41_s6 = int_to_ptr.vmem [resolvable:$true] %s40_s6 }
  0x16   :  { %s2318_s9 = scalar_lea.hbm %s2621_s0, 128 }
  0x17   :  { %p2319_p8 = scmp.ne.s32.totalorder %s2621_s0, %s2318_s9  ;;  %p2322_p9 = scmp.lt.u32.totalorder %s2318_s9, %s2621_s0 }
  0x19   :  { %p2324_p10 = pnand %p2322_p9, %p2319_p8 }
  0x1b   :  { %2327 = shalt.err (!%p2324_p10)
}
  0x1c   :  { %s2328_s1 = scalar_lea.vmem %s20_s30, 128  ;;  %p2333_p12 = scmp.lt.s32.totalorder %s20_s30, %s20_s30 }
  0x1d   :  { %p2329_p11 = scmp.ne.s32.totalorder %s20_s30, %s2328_s1  ;;  %p2334_p13 = scmp.lt.s32.totalorder %s2328_s1, %s2328_s1 }
  0x1f   :  { %p2335_p0 = por %p2334_p13, %p2333_p12 }
  0x21   :  { %p2336_p1 = pnand %p2335_p0, %p2329_p11 }
  0x23   :  { %2339 = shalt.err (!%p2336_p1)
}
  0x24   :  { %22 = dma.hbm_to_vmem [thread:$0]  %s2621_s0, 128, %s20_s30, [#allocation3]  }
  0x25   :  { %s2340_s18 = scalar_lea.hbm %s2623_s2, 13312 }
  0x26   :  { %p2341_p2 = scmp.ne.s32.totalorder %s2623_s2, %s2340_s18  ;;  %p2344_p3 = scmp.lt.u32.totalorder %s2340_s18, %s2623_s2 }
  0x28   :  { %p2346_p4 = pnand %p2344_p3, %p2341_p2 }
  0x2a   :  { %2349 = shalt.err (!%p2346_p4)
}
  0x2b   :  { %s2350_s23 = scalar_lea.vmem %s41_s6, 13312  ;;  %p2355_p6 = scmp.lt.s32.totalorder %s41_s6, %s41_s6 }
  0x2c   :  { %p2351_p5 = scmp.ne.s32.totalorder %s41_s6, %s2350_s23  ;;  %p2356_p7 = scmp.lt.s32.totalorder %s2350_s23, %s2350_s23 }
  0x2e   :  { %p2357_p8 = por %p2356_p7, %p2355_p6 }
  0x30   :  { %p2358_p9 = pnand %p2357_p8, %p2351_p5 }
  0x32   :  { %2361 = shalt.err (!%p2358_p9)
}
  0x33   :  { %s2419_s0 = smov 832   ;;  %s2420_s24 = smov 52  }
  0x34   :  { %46 = dma.hbm_to_vmem [thread:$0]  %s2623_s2, 13312, %s41_s6, [#allocation6], %s2419_s0, %s2419_s0, %s2420_s24  }
  0x35   :  { %s2421_s27 = smov [#allocation8]   ;;  %s2362_s5 = scalar_lea.hbm %s2624_s3, 4608 }
  0x36   :  { %s52_s28 = sshll.u32 %s2421_s27, 4  ;;  %p2363_p10 = scmp.ne.s32.totalorder %s2624_s3, %s2362_s5  ;;  %s53_s28 = int_to_ptr.vmem [resolvable:$true] %s52_s28 }
  0x37   :  { %p2366_p11 = scmp.lt.u32.totalorder %s2362_s5, %s2624_s3 }
  0x39   :  { %p2368_p12 = pnand %p2366_p11, %p2363_p10 }
  0x3b   :  { %2371 = shalt.err (!%p2368_p12)
}
  0x3c   :  { %s2372_s11 = scalar_lea.vmem %s53_s28, 4608  ;;  %p2377_p0 = scmp.lt.s32.totalorder %s53_s28, %s53_s28 }
  0x3d   :  { %p2373_p13 = scmp.ne.s32.totalorder %s53_s28, %s2372_s11  ;;  %p2378_p1 = scmp.lt.s32.totalorder %s2372_s11, %s2372_s11 }
  0x3f   :  { %p2379_p2 = por %p2378_p1, %p2377_p0 }
  0x41   :  { %p2380_p3 = pnand %p2379_p2, %p2373_p13 }
  0x43   :  { %2383 = shalt.err (!%p2380_p3)
}
  0x44   :  { %s2422_s2 = smov 64   ;;  %s2423_s6 = smov 4  }
  0x45   :  { %58 = dma.hbm_to_vmem [thread:$0]  %s2624_s3, 4608, %s53_s28, [#allocation9], %s2422_s2, %s2422_s2, %s2423_s6  }
  0x46   :  { %2406 = dma.done.wait [#allocation3], 128  }
  0x47   :  { %2407 = vsyncadd [#allocation3], 4294967168 }
  0x48   :  { %2408 = dma.done.wait [#allocation6], 14336  }
  0x49   :  { %2409 = vsyncadd [#allocation6], 4294952960 }
  0x4a   :  { %2410 = dma.done.wait [#allocation9], 4608  }
  0x4b   :  { %2411 = vsyncadd [#allocation9], 4294962688  ;;  %v82_v0 = vlaneseq  ;;  %v2424_v1 = vmov 0.0   ;;  %v2504_v4 = vld [vmem:[#allocation2] sm:$0xff]  ;;  %v2090_v10 = vld [vmem:[#allocation7] ss:$52 sps:$4 sm:$0xff]  }
  0x4c   :  { %1976 = vmatprep.subr.bf16.mxu1 %v2424_v1  ;;  %v76_v5 = vld [vmem:[#allocation5 + $0x18] sm:$0x1]  ;;  %v81_v6 = vmul.f32 %v2504_v4, %v2504_v4  ;;  %v2091_v11 = vld [vmem:[#allocation7 + $0x8] ss:$52 sps:$4 sm:$0xff]   ;;  %v2092_v12 = vld [vmem:[#allocation7 + $0x6c] ss:$52 sps:$4 sm:$0xff]  }
  0x4d   :  { %v83_v2 = vshrl.u32 %v82_v0, 7  ;;  %v2088_v8 = vld [vmem:[#allocation7 + $0x4] ss:$52 sps:$4 sm:$0xff]   ;;  %1977 = vmatpush3.bf16.msra.mxu1 %v2091_v11  ;;  %v93_v13 = vsub.f32 1.0, %v76_v5  ;;  %v2094_v15 = vld [vmem:[#allocation7 + $0x68] ss:$52 sps:$4 sm:$0xff]  }
  0x4e   :  { %270 = vmatprep.subr.bf16.mxu0 %v2088_v8  ;;  %1978 = vmatprep.subr.bf16.mxu1 %v2424_v1  ;;  %v2095_v16 = vld [vmem:[#allocation7 + $0x70] ss:$52 sps:$4 sm:$0xff]   ;;  %v2096_v17 = vld [vmem:[#allocation7 + $0xd4] ss:$52 sps:$4 sm:$0xff]   ;;  %v2099_v19 = vld [vmem:[#allocation7 + $0xd8] ss:$52 sps:$4 sm:$0xff]  }
  0x4f   :  { %v84_v3 = vsub.s32 0, %v83_v2  ;;  %271 = vmatpush1.bf16.msra.mxu0 %v2090_v10  ;;  %v2098_v18 = vld [vmem:[#allocation7 + $0xd0] ss:$52 sps:$4 sm:$0xff]   ;;  %v2102_v21 = vld [vmem:[#allocation7 + $0x138] ss:$52 sps:$4 sm:$0xff]   ;;  %v2425_v32 = vmov 0  }
  0x50   :  { %272 = vmatprep.subr.bf16.mxu0 %v2092_v12  ;;  %v2100_v20 = vld [vmem:[#allocation7 + $0x13c] ss:$52 sps:$4 sm:$0xff]   ;;  %v2103_v22 = vld [vmem:[#allocation7 + $0x140] ss:$52 sps:$4 sm:$0xff]   ;;  %v2104_v23 = vld [vmem:[#allocation7 + $0x1a4] ss:$52 sps:$4 sm:$0xff]   ;;  %302 = vmatprep.mubr.bf16.mxu0 %v2425_v32 }
  0x51   :  { %v2508_v7 = vrot.slane %v76_v5, %v84_v3  ;;  %v2512_v14 = vrot.slane %v93_v13, %v84_v3  ;;  %1979 = vmatpush3.bf16.msra.mxu1 %v2095_v16  ;;  %v2106_v24 = vld [vmem:[#allocation7 + $0x1a0] ss:$52 sps:$4 sm:$0xff]   ;;  %v2107_v25 = vld [vmem:[#allocation7 + $0x1a8] ss:$52 sps:$4 sm:$0xff]   ;;  %v2111_v28 = vld [vmem:[#allocation7 + $0x210] ss:$52 sps:$4 sm:$0xff]  }
  0x52   :  { %1980 = vmatprep.subr.bf16.mxu1 %v2424_v1  ;;  %v2108_v26 = vld [vmem:[#allocation7 + $0x20c] ss:$52 sps:$4 sm:$0xff]   ;;  %v2110_v27 = vld [vmem:[#allocation7 + $0x208] ss:$52 sps:$4 sm:$0xff]   ;;  %v2114_v30 = vld [vmem:[#allocation7 + $0x270] ss:$52 sps:$4 sm:$0xff]  }
  0x53   :  { %v86_v9 = vmul.f32 %v2508_v7, %v81_v6  ;;  %273 = vmatpush1.bf16.msra.mxu0 %v2094_v15  ;;  %v2112_v29 = vld [vmem:[#allocation7 + $0x274] ss:$52 sps:$4 sm:$0xff]   ;;  %v2115_v31 = vld [vmem:[#allocation7 + $0x278] ss:$52 sps:$4 sm:$0xff]   ;;  %vm2426_vm0 = vmmov 0   ;;  %s2427_s3 = smov 127  }
  0x54   :  { %274 = vmatprep.subr.bf16.mxu0 %v2096_v17  ;;  %1992 = vmatprep.mubr.msk.bf16.mxu1 %vm2426_vm0, %v2424_v1  ;;  %v2116_v33 = vld [vmem:[#allocation7 + $0x2dc] ss:$52 sps:$4 sm:$0xff]   ;;  %v2118_v34 = vld [vmem:[#allocation7 + $0x2d8] ss:$52 sps:$4 sm:$0xff]   ;;  %v2119_v35 = vld [vmem:[#allocation7 + $0x2e0] ss:$52 sps:$4 sm:$0xff]  }
  0x55   :  { %87 = vadd.xlane.f32.xlu0 %v86_v9  ;;  %1981 = vmatpush3.bf16.msra.mxu1 %v2099_v19  ;;  %v1740_v45 = vld [vmem:[#allocation5] ss:$0 sm:$0xff]  ;;  %vm381_vm1 = vcmask 1043456   ;;  %s2428_s1 = smov 1   ;;  %v2536_v62 = vld [vmem:[#allocation8 + $0x8] sm:$0xff]   ;;  %v2540_v0 = vld [vmem:[#allocation8 + $0x10] sm:$0xff]  }
  0x56   :  { %1982 = vmatprep.subr.bf16.mxu1 %v2424_v1  ;;  %v2532_v56 = vld [vmem:[#allocation8] sm:$0xff]   ;;  %v2544_v3 = vld [vmem:[#allocation8 + $0x18] sm:$0xff]   ;;  %v78_v8 = vld [vmem:[#allocation5 + $0x28] sm:$0xff]  ;;  %vm466_vm2 = vcmask 523264   ;;  %s2429_s14 = smov [#allocation10]  }
  0x57   :  { %275 = vmatpush1.bf16.msra.mxu0 %v2098_v18  ;;  %v80_v11 = vld [vmem:[#allocation5 + $0x38] sm:$0xff]  ;;  %s1729_s15 = sshll.u32 %s2429_s14, 4  ;;  %s1730_s15 = int_to_ptr.vmem [resolvable:$true] %s1729_s15 }
  0x58   :  { %276 = vmatprep.subr.bf16.mxu0 %v2100_v20  ;;  %s2384_s16 = scalar_lea.vmem %s1730_s15, 128  ;;  %p2389_p5 = scmp.lt.s32.totalorder %s1730_s15, %s1730_s15 }
  0x59   :  { %89 = vadd.xlane.f32.xlu0 %v81_v6  ;;  %1983 = vmatpush3.bf16.msra.mxu1 %v2103_v22  ;;  %v79_v6 = vld [vmem:[#allocation5 + $0x30] sm:$0xff]  ;;  %p2385_p4 = scmp.ne.s32.totalorder %s1730_s15, %s2384_s16  ;;  %p2390_p6 = scmp.lt.s32.totalorder %s2384_s16, %s2384_s16 }
  0x5a   :  { %1984 = vmatprep.subr.bf16.mxu1 %v2424_v1 }
  0x5b   :  { %277 = vmatpush1.bf16.msra.mxu0 %v2102_v21  ;;  %p2391_p7 = por %p2390_p6, %p2389_p5 }
  0x5c   :  { %278 = vmatprep.subr.bf16.mxu0 %v2104_v23 }
  0x5d   :  { %1985 = vmatpush3.bf16.msra.mxu1 %v2107_v25  ;;  %p2392_p8 = pnand %p2391_p7, %p2385_p4 }
  0x5e   :  { %1986 = vmatprep.subr.bf16.mxu1 %v2424_v1 }
  0x5f   :  { %279 = vmatpush1.bf16.msra.mxu0 %v2106_v24 }
  0x60   :  { %280 = vmatprep.subr.bf16.mxu0 %v2108_v26 }
  0x61   :  { %1987 = vmatpush3.bf16.msra.mxu1 %v2111_v28 }
  0x62   :  { %1988 = vmatprep.subr.bf16.mxu1 %v2424_v1 }
  0x63   :  { %281 = vmatpush1.bf16.msra.mxu0 %v2110_v27 }
  0x64   :  { %282 = vmatprep.subr.bf16.mxu0 %v2112_v29 }
  0x65   :  { %1989 = vmatpush3.bf16.msra.mxu1 %v2115_v31 }
  0x66   :  { %1990 = vmatprep.subr.bf16.mxu1 %v2424_v1 }
  0x67   :  { %283 = vmatpush1.bf16.msra.mxu0 %v2114_v30 }
  0x68   :  { %284 = vmatprep.subr.bf16.mxu0 %v2116_v33 }
  0x69   :  { %1991 = vmatpush3.bf16.msra.mxu1 %v2119_v35  ;;  %v77_v35 = vld [vmem:[#allocation5 + $0x20] sm:$0xff] }
  0x6a   :  { %2008 = vmatprep.subr.bf16.mxu1 %v2424_v1 }
  0x6b   :  { %285 = vmatpush1.bf16.msra.mxu0 %v2118_v34 }
  0x6c   :  { %1996 = vmatprep.subr.bf16.mxu0 %v2424_v1 }
  0xe2   :  { %v88_v36 = vpop.xlane.xlu0 %87 }
  0xe3   :  { %v92_v39 = vmul.f32 %v88_v36, %v2508_v7 }
  0xe6   :  { %v90_v37 = vpop.xlane.xlu0 %89 }
  0xe7   :  { %v91_v38 = vsub.f32 %v90_v37, %v88_v36 }
  0xe9   :  { %v98_v40 = vmul.f32 %v2512_v14, %v91_v38 }
  0xeb   :  { %v99_v41 = vadd.f32 %v98_v40, %v92_v39 }
  0xed   :  { %v100_v42 = vmul.f32 0.015625, %v99_v41 }
  0xef   :  { %v101_v43 = vadd.f32 1e-05, %v100_v42 }
  0xf1   :  { %2268 = vrsqrt.f32 %v101_v43 }
  0xfb   :  { %v2269_v44 = vpop.eup %2268 }
  0xfc   :  { %v103_v46 = vmul.f32 %v2269_v44, %v2504_v4 }
  0xfe   :  { %v108_v47 = vmul.f32 %v1740_v45, %v103_v46 }
 0x100   :  { %v109_v48 = vpack.c.bf16 %v108_v47, %v108_v47  ;;  %v2124_v47 = vld [vmem:[#allocation7 + $0xc] ss:$52 sps:$4 sm:$0xff]  }
 0x102   :  { %303 = vmatmul.mubr.bf16.vlgmr.msra.gmra.mrb[0].mxu0 %v109_v48  ;;  %1993 = vmatmul.mubr.bf16.vlgmr.msra.gmra.mrb[0].mxu1 %v109_v48  ;;  %v2125_v48 = vld [vmem:[#allocation7 + $0x74] ss:$52 sps:$4 sm:$0xff]  }
 0x103   :  { %2004 = vmatprep.mubr.msk.bf16.mxu0 %vm2426_vm0, %v2424_v1  ;;  %2016 = vmatprep.mubr.msk.bf16.mxu1 %vm2426_vm0, %v2424_v1 }
 0x1d5   :  { %v304_v49 = vpop.f32.mrb[0].mxu0  ;;  %v345_v50 = vpop.f32.mrb[0].mxu1 }
 0x1d6   :  { %v378_v51 = vpack.c.bf16 %v345_v50, %v345_v50  ;;  %v1994_v52 = vpop.f32.mrb[1].mxu1  ;;  %352 = vrot.lane.b32.xlu0 %v304_v49, %s2427_s3  ;;  %v306_v53 = vpop.f32.mrb[1].mxu0  ;;  %v351_v27 = vmul.f32 %v304_v49, %v78_v8  ;;  %v2127_v50 = vld [vmem:[#allocation7 + $0x144] ss:$52 sps:$4 sm:$0xff]  }
 0x1d7   :  { %v348_v54 = vpop.f32.mrb[2].mxu1  ;;  %361 = vrot.lane.b32.xlu1 %v306_v53, %s2427_s3  ;;  %v308_v55 = vpop.f32.mrb[2].mxu0  ;;  %v360_v12 = vmul.f32 %v306_v53, %v78_v8  ;;  %v2129_v52 = vld [vmem:[#allocation7 + $0x214] ss:$52 sps:$4 sm:$0xff]  }
 0x1d8   :  { %v415_v57 = vrot.slane %v378_v51, 4  ;;  %v309_v58 = vpop.f32.mrb[3].mxu0  ;;  %v1995_v59 = vpop.f32.mrb[3].mxu1  ;;  %v2131_v54 = vld [vmem:[#allocation7 + $0x2e4] ss:$52 sps:$4 sm:$0xff]  }
 0x1d9   :  { %v2135_v8 = vld [vmem:[#allocation7 + $0x148] ss:$52 sps:$4 sm:$0xff]  }
 0x1da   :  { %v418_v60 = vsel %vm381_vm1, %v378_v51, %v415_v57  ;;  %v2128_v51 = vld [vmem:[#allocation7 + $0x1ac] ss:$52 sps:$4 sm:$0xff]  }
 0x1db   :  { %365 = vrot.lane.b32.xlu1 %v306_v53, %s2428_s1  ;;  %v420_v61 = vmul.bf16 %v2532_v56, %v418_v60  ;;  %v421_v63 = vmul.bf16 %v2536_v62, %v418_v60  ;;  %v422_v2 = vmul.bf16 %v2540_v0, %v418_v60  ;;  %v423_v5 = vmul.bf16 %v2544_v3, %v418_v60  ;;  %v2130_v53 = vld [vmem:[#allocation7 + $0x27c] ss:$52 sps:$4 sm:$0xff]  }
 0x1dd   :  { %2009 = vmatpush3.bf16.msra.mxu1 %v420_v61 }
 0x1de   :  { %2010 = vmatprep.subr.bf16.mxu1 %v2424_v1 }
 0x1df   :  { %356 = vrot.lane.b32.xlu1 %v304_v49, %s2428_s1  ;;  %v2126_v49 = vld [vmem:[#allocation7 + $0xdc] ss:$52 sps:$4 sm:$0xff]  }
 0x1e1   :  { %2011 = vmatpush3.bf16.msra.mxu1 %v421_v63 }
 0x1e2   :  { %2012 = vmatprep.subr.bf16.mxu1 %v2424_v1 }
 0x1e5   :  { %2013 = vmatpush3.bf16.msra.mxu1 %v422_v2 }
 0x1e6   :  { %2014 = vmatprep.subr.bf16.mxu1 %v2424_v1 }
 0x1e9   :  { %2015 = vmatpush3.bf16.msra.mxu1 %v423_v5  ;;  %v2133_v5 = vld [vmem:[#allocation7 + $0x78] ss:$52 sps:$4 sm:$0xff]  }
 0x1ea   :  { %2020 = vmatprep.subr.bf16.mxu1 %v2424_v1 }
 0x248   :  { %v353_v23 = vpop.permute.xlu0 %352 }
 0x249   :  { %v362_v9 = vpop.permute.xlu1 %361  ;;  %v354_v26 = vmul.f32 %v353_v23, %v79_v6 }
 0x24a   :  { %v363_v10 = vmul.f32 %v362_v9, %v79_v6  ;;  %v2134_v6 = vld [vmem:[#allocation7 + $0xe0] ss:$52 sps:$4 sm:$0xff]   ;;  %v2136_v9 = vld [vmem:[#allocation7 + $0x1b0] ss:$52 sps:$4 sm:$0xff]  }
 0x24b   :  { %v355_v29 = vadd.f32 %v354_v26, %v351_v27  ;;  %v2142_v26 = vld [vmem:[#allocation7 + $0x18] ss:$52 sps:$4 sm:$0xff]   ;;  %v2143_v27 = vld [vmem:[#allocation7 + $0x1c] ss:$52 sps:$4 sm:$0xff]  }
 0x24c   :  { %v364_v15 = vadd.f32 %v363_v10, %v360_v12  ;;  %v2137_v10 = vld [vmem:[#allocation7 + $0x218] ss:$52 sps:$4 sm:$0xff]   ;;  %v2139_v12 = vld [vmem:[#allocation7 + $0x2e8] ss:$52 sps:$4 sm:$0xff]  }
 0x24d   :  { %v366_v13 = vpop.permute.xlu1 %365 }
 0x24e   :  { %v367_v16 = vmul.f32 %v366_v13, %v80_v11  ;;  %v1771_v13 = vld [vmem:[#allocation5 + $0x10] ss:$0 sm:$0xff] }
 0x250   :  { %v368_v17 = vadd.f32 %v367_v16, %v364_v15 }
 0x251   :  { %v357_v24 = vpop.permute.xlu1 %356 }
 0x252   :  { %v377_v18 = vpack.c.bf16 %v368_v17, %v368_v17  ;;  %v358_v28 = vmul.f32 %v357_v24, %v80_v11  ;;  %v2138_v11 = vld [vmem:[#allocation7 + $0x280] ss:$52 sps:$4 sm:$0xff]  }
 0x254   :  { %v380_v19 = vrot.slane %v377_v18, 4  ;;  %v359_v30 = vadd.f32 %v358_v28, %v355_v29  ;;  %v2145_v28 = vld [vmem:[#allocation7 + $0x20] ss:$52 sps:$4 sm:$0xff]  }
 0x256   :  { %v384_v20 = vsel %vm381_vm1, %v377_v18, %v380_v19  ;;  %v424_v33 = vmul.f32 0.25, %v359_v30 }
 0x257   :  { %v410_v21 = vmul.bf16 %v2532_v56, %v384_v20  ;;  %v411_v22 = vmul.bf16 %v2536_v62, %v384_v20  ;;  %v412_v25 = vmul.bf16 %v2540_v0, %v384_v20  ;;  %v413_v31 = vmul.bf16 %v2544_v3, %v384_v20 }
 0x258   :  { %v425_v34 = vpack.c.bf16 %v424_v33, %v424_v33 }
 0x259   :  { %1997 = vmatpush3.bf16.xpose.msra.mxu0 %v410_v21 }
 0x25a   :  { %1998 = vmatprep.subr.bf16.mxu0 %v2424_v1 }
 0x261   :  { %1999 = vmatpush3.bf16.xpose.msra.mxu0 %v411_v22 }
 0x262   :  { %2000 = vmatprep.subr.bf16.mxu0 %v2424_v1 }
 0x269   :  { %2001 = vmatpush3.bf16.xpose.msra.mxu0 %v412_v25 }
 0x26a   :  { %2002 = vmatprep.subr.bf16.mxu0 %v2424_v1 }
 0x271   :  { %2003 = vmatpush3.bf16.xpose.msra.mxu0 %v413_v31 }
 0x272   :  { %2032 = vmatprep.subr.bf16.mxu0 %v2424_v1 }
 0x278   :  { %2005 = vmatmul.mubr.bf16.vlgmr.msra.gmra.mrb[4].mxu0 %v425_v34 }
 0x279   :  { %2048 = vmatprep.mubr.msk.bf16.mxu0 %vm2426_vm0, %v2424_v1  ;;  %2033 = vmatpush3.bf16.msra.mxu0 %v2124_v47  ;;  %v2161_v47 = vld [vmem:[#allocation7 + $0x154] ss:$52 sps:$4 sm:$0xff]  }
 0x27a   :  { %2034 = vmatprep.subr.bf16.mxu0 %v2424_v1 }
 0x27d   :  { %2035 = vmatpush3.bf16.msra.mxu0 %v2125_v48  ;;  %v2166_v48 = vld [vmem:[#allocation7 + $0x1b8] ss:$52 sps:$4 sm:$0xff]  }
 0x27e   :  { %2036 = vmatprep.subr.bf16.mxu0 %v2424_v1 }
 0x281   :  { %2037 = vmatpush3.bf16.msra.mxu0 %v2126_v49  ;;  %v2169_v49 = vld [vmem:[#allocation7 + $0x1c0] ss:$52 sps:$4 sm:$0xff]  }
 0x282   :  { %2038 = vmatprep.subr.bf16.mxu0 %v2424_v1 }
 0x285   :  { %2039 = vmatpush3.bf16.msra.mxu0 %v2127_v50  ;;  %v2164_v50 = vld [vmem:[#allocation7 + $0x1b4] ss:$52 sps:$4 sm:$0xff]  }
 0x286   :  { %2040 = vmatprep.subr.bf16.mxu0 %v2424_v1 }
 0x289   :  { %2041 = vmatpush3.bf16.msra.mxu0 %v2128_v51  ;;  %v2167_v51 = vld [vmem:[#allocation7 + $0x1bc] ss:$52 sps:$4 sm:$0xff]  }
 0x28a   :  { %2042 = vmatprep.subr.bf16.mxu0 %v2424_v1 }
 0x28d   :  { %2043 = vmatpush3.bf16.msra.mxu0 %v2129_v52  ;;  %v2172_v52 = vld [vmem:[#allocation7 + $0x220] ss:$52 sps:$4 sm:$0xff]  }
 0x28e   :  { %2044 = vmatprep.subr.bf16.mxu0 %v2424_v1 }
 0x291   :  { %2045 = vmatpush3.bf16.msra.mxu0 %v2130_v53  ;;  %v2170_v53 = vld [vmem:[#allocation7 + $0x21c] ss:$52 sps:$4 sm:$0xff]  }
 0x292   :  { %2046 = vmatprep.subr.bf16.mxu0 %v2424_v1 }
 0x295   :  { %2047 = vmatpush3.bf16.msra.mxu0 %v2131_v54  ;;  %v2173_v54 = vld [vmem:[#allocation7 + $0x224] ss:$52 sps:$4 sm:$0xff]  }
 0x296   :  { %1185 = vmatprep.subr.bf16.mxu0 %v2142_v26  ;;  %v2208_v26 = vld [vmem:[#allocation7 + $0x160] ss:$52 sps:$4 sm:$0xff]  }
 0x34b   :  { %v460_v36 = vpop.f32.mrb[4].mxu0 }
 0x34c   :  { %v461_v37 = vadd.f32 %v460_v36, %v77_v35  ;;  %v2006_v38 = vpop.f32.mrb[5].mxu0 }
 0x34d   :  { %v463_v39 = vpop.f32.mrb[6].mxu0  ;;  %v2151_v38 = vld [vmem:[#allocation7 + $0x88] ss:$52 sps:$4 sm:$0xff]  }
 0x34e   :  { %v2007_v40 = vpop.f32.mrb[7].mxu0  ;;  %v467_v41 = vsel %vm466_vm2, %v461_v37, -inf  ;;  %v2146_v39 = vld [vmem:[#allocation7 + $0x7c] ss:$52 sps:$4 sm:$0xff]  }
 0x34f   :  { %468 = vmax.xlane.f32.xlu1 %v467_v41  ;;  %v2149_v40 = vld [vmem:[#allocation7 + $0x84] ss:$52 sps:$4 sm:$0xff]  }
 0x350   :  { %v2157_v41 = vld [vmem:[#allocation7 + $0xf0] ss:$52 sps:$4 sm:$0xff]  }
 0x3dc   :  { %v469_v42 = vpop.xlane.xlu1 %468 }
 0x3dd   :  { %v470_v43 = vsub.f32 %v461_v37, %v469_v42  ;;  %v2148_v37 = vld [vmem:[#allocation7 + $0x80] ss:$52 sps:$4 sm:$0xff]   ;;  %v2152_v42 = vld [vmem:[#allocation7 + $0xe4] ss:$52 sps:$4 sm:$0xff]  }
 0x3df   :  { %v471_v44 = vmul.f32 1.442695, %v470_v43  ;;  %v2155_v43 = vld [vmem:[#allocation7 + $0xec] ss:$52 sps:$4 sm:$0xff]  }
 0x3e1   :  { %2270 = vpow2.f32 %v471_v44  ;;  %v2160_v44 = vld [vmem:[#allocation7 + $0x150] ss:$52 sps:$4 sm:$0xff]  }
 0x3eb   :  { %v2271_v45 = vpop.eup %2270 }
 0x3ec   :  { %v473_v46 = vpack.c.bf16 %v2271_v45, %v2271_v45  ;;  %v2163_v45 = vld [vmem:[#allocation7 + $0x158] ss:$52 sps:$4 sm:$0xff]  }
 0x3ee   :  { %2017 = vmatmul.mubr.msk.bf16.vlgmr.msra.gmra.mrb[4].mxu1 %vm466_vm2, %v473_v46 }
 0x3ef   :  { %2021 = vmatpush3.bf16.msra.mxu1 %v2532_v56  ;;  %2028 = vmatprep.mubr.msk.bf16.mxu1 %vm2426_vm0, %v2424_v1 }
 0x3f0   :  { %2022 = vmatprep.subr.bf16.mxu1 %v2424_v1 }
 0x3f3   :  { %2023 = vmatpush3.bf16.msra.mxu1 %v2536_v62 }
 0x3f4   :  { %2024 = vmatprep.subr.bf16.mxu1 %v2424_v1 }
 0x3f7   :  { %2025 = vmatpush3.bf16.msra.mxu1 %v2540_v0 }
 0x3f8   :  { %2026 = vmatprep.subr.bf16.mxu1 %v2424_v1 }
 0x3fb   :  { %2027 = vmatpush3.bf16.msra.mxu1 %v2544_v3  ;;  %v2132_v3 = vld [vmem:[#allocation7 + $0x10] ss:$52 sps:$4 sm:$0xff]  }
 0x3fc   :  { %2052 = vmatprep.subr.bf16.mxu1 %v2424_v1 }
 0x3fe   :  { %2029 = vmatmul.mubr.msk.bf16.vlgmr.msra.gmra.mrb[8].mxu1 %vm466_vm2, %v473_v46  ;;  %v2158_v46 = vld [vmem:[#allocation7 + $0x14c] ss:$52 sps:$4 sm:$0xff]  }
 0x3ff   :  { %2068 = vmatprep.mubr.msk.bf16.mxu1 %vm2426_vm0, %v2424_v1  ;;  %2053 = vmatpush3.bf16.msra.mxu1 %v2132_v3 }
 0x400   :  { %2054 = vmatprep.subr.bf16.mxu1 %v2424_v1 }
 0x403   :  { %2055 = vmatpush3.bf16.msra.mxu1 %v2133_v5 }
 0x404   :  { %2056 = vmatprep.subr.bf16.mxu1 %v2424_v1 }
 0x407   :  { %2057 = vmatpush3.bf16.msra.mxu1 %v2134_v6 }
 0x408   :  { %2058 = vmatprep.subr.bf16.mxu1 %v2424_v1 }
 0x40b   :  { %2059 = vmatpush3.bf16.msra.mxu1 %v2135_v8 }
 0x40c   :  { %2060 = vmatprep.subr.bf16.mxu1 %v2424_v1 }
 0x40f   :  { %2061 = vmatpush3.bf16.msra.mxu1 %v2136_v9 }
 0x410   :  { %2062 = vmatprep.subr.bf16.mxu1 %v2424_v1 }
 0x413   :  { %2063 = vmatpush3.bf16.msra.mxu1 %v2137_v10 }
 0x414   :  { %2064 = vmatprep.subr.bf16.mxu1 %v2424_v1 }
 0x417   :  { %2065 = vmatpush3.bf16.msra.mxu1 %v2138_v11 }
 0x418   :  { %2066 = vmatprep.subr.bf16.mxu1 %v2424_v1  ;;  %v2140_v1 = vld [vmem:[#allocation7 + $0x14] ss:$52 sps:$4 sm:$0xff]  }
 0x41b   :  { %2067 = vmatpush3.bf16.msra.mxu1 %v2139_v12 }
 0x41c   :  { %1226 = vmatprep.subr.bf16.mxu1 %v2145_v28  ;;  %v2206_v28 = vld [vmem:[#allocation7 + $0x15c] ss:$52 sps:$4 sm:$0xff]  }
 0x4c1   :  { %v511_v55 = vpop.f32.mrb[4].mxu1 }
 0x4c2   :  { %v2018_v56 = vpop.f32.mrb[5].mxu1 }
 0x4c3   :  { %v514_v57 = vpop.f32.mrb[6].mxu1  ;;  %v2178_v56 = vld [vmem:[#allocation7 + $0x288] ss:$52 sps:$4 sm:$0xff]  }
 0x4c4   :  { %v2019_v58 = vpop.f32.mrb[7].mxu1  ;;  %v2181_v57 = vld [vmem:[#allocation7 + $0x290] ss:$52 sps:$4 sm:$0xff]  }
 0x4c5   :  { %v2176_v58 = vld [vmem:[#allocation7 + $0x284] ss:$52 sps:$4 sm:$0xff]  }
 0x4d1   :  { %v551_v59 = vpop.f32.mrb[8].mxu1 }
 0x4d2   :  { %2272 = vrcp.f32 %v551_v59  ;;  %v2030_v60 = vpop.f32.mrb[9].mxu1  ;;  %v2179_v59 = vld [vmem:[#allocation7 + $0x28c] ss:$52 sps:$4 sm:$0xff]  }
 0x4d3   :  { %v554_v61 = vpop.f32.mrb[10].mxu1  ;;  %v2184_v60 = vld [vmem:[#allocation7 + $0x2f0] ss:$52 sps:$4 sm:$0xff]  }
 0x4d4   :  { %v2031_v62 = vpop.f32.mrb[11].mxu1  ;;  %v2187_v61 = vld [vmem:[#allocation7 + $0x2f8] ss:$52 sps:$4 sm:$0xff]  }
 0x4d5   :  { %v2182_v62 = vld [vmem:[#allocation7 + $0x2ec] ss:$52 sps:$4 sm:$0xff]  }
 0x4dc   :  { %v2273_v63 = vpop.eup %2272 }
 0x4dd   :  { %v558_v0 = vmul.f32 %v2273_v63, %v511_v55  ;;  %v2175_v55 = vld [vmem:[#allocation7 + $0x228] ss:$52 sps:$4 sm:$0xff]  }
 0x4de   :  { %v2185_v63 = vld [vmem:[#allocation7 + $0x2f4] ss:$52 sps:$4 sm:$0xff]  }
 0x4df   :  { %v559_v2 = vpack.c.bf16 %v558_v0, %v558_v0  ;;  %v2190_v0 = vld [vmem:[#allocation7 + $0x28] ss:$52 sps:$4 sm:$0xff]  }
 0x4e1   :  { %2049 = vmatmul.mubr.bf16.vlgmr.msra.gmra.mrb[8].mxu0 %v559_v2  ;;  %v2193_v2 = vld [vmem:[#allocation7 + $0x30] ss:$52 sps:$4 sm:$0xff]  }
 0x4e2   :  { %1217 = vmatprep.mubr.bf16.mxu0 %v2425_v32  ;;  %1186 = vmatpush1.bf16.msra.mxu0 %v2140_v1  ;;  %v2203_v1 = vld [vmem:[#allocation7 + $0xfc] ss:$52 sps:$4 sm:$0xff]  }
 0x4e3   :  { %1187 = vmatprep.subr.bf16.mxu0 %v2148_v37  ;;  %v2218_v37 = vld [vmem:[#allocation7 + $0x22c] ss:$52 sps:$4 sm:$0xff]  }
 0x4e6   :  { %1188 = vmatpush1.bf16.msra.mxu0 %v2146_v39  ;;  %v2226_v39 = vld [vmem:[#allocation7 + $0x298] ss:$52 sps:$4 sm:$0xff]  }
 0x5b4   :  { %v662_v15 = vpop.f32.mrb[8].mxu0 }
 0x5b5   :  { %v663_v16 = vadd.f32 %v1771_v13, %v662_v15  ;;  %v2050_v17 = vpop.f32.mrb[9].mxu0  ;;  %v1789_v15 = vld [vmem:[#allocation5 + $0x8] ss:$0 sm:$0xff] }
 0x5b6   :  { %v665_v18 = vpop.f32.mrb[10].mxu0 }
 0x5b7   :  { %v1780_v19 = vmul.f32 -1.442695, %v663_v16  ;;  %v2051_v20 = vpop.f32.mrb[11].mxu0  ;;  %v2188_v18 = vld [vmem:[#allocation7 + $0x24] ss:$52 sps:$4 sm:$0xff]  }
 0x5b9   :  { %2274 = vpow2.f32 %v1780_v19  ;;  %v2191_v19 = vld [vmem:[#allocation7 + $0x2c] ss:$52 sps:$4 sm:$0xff]  }
 0x5c3   :  { %v2275_v21 = vpop.eup %2274 }
 0x5c4   :  { %v671_v22 = vadd.f32 1.0, %v2275_v21  ;;  %v2196_v21 = vld [vmem:[#allocation7 + $0x90] ss:$52 sps:$4 sm:$0xff]  }
 0x5c6   :  { %2276 = vrcp.f32 %v671_v22  ;;  %v2199_v22 = vld [vmem:[#allocation7 + $0x98] ss:$52 sps:$4 sm:$0xff]  }
 0x5d0   :  { %v2277_v23 = vpop.eup %2276 }
 0x5d1   :  { %v674_v24 = vmul.f32 %v2277_v23, %v663_v16  ;;  %v2202_v23 = vld [vmem:[#allocation7 + $0xf8] ss:$52 sps:$4 sm:$0xff]  }
 0x5d3   :  { %v675_v25 = vpack.c.bf16 %v674_v24, %v674_v24  ;;  %v2205_v24 = vld [vmem:[#allocation7 + $0x100] ss:$52 sps:$4 sm:$0xff]  }
 0x5d5   :  { %2069 = vmatmul.mubr.bf16.vlgmr.msra.gmra.mrb[12].mxu1 %v675_v25  ;;  %v2200_v25 = vld [vmem:[#allocation7 + $0xf4] ss:$52 sps:$4 sm:$0xff]  }
 0x5d6   :  { %1258 = vmatprep.mubr.bf16.mxu1 %v2425_v32  ;;  %1227 = vmatpush1.bf16.msra.mxu1 %v2143_v27  ;;  %v2211_v27 = vld [vmem:[#allocation7 + $0x168] ss:$52 sps:$4 sm:$0xff]  }
 0x5d7   :  { %1228 = vmatprep.subr.bf16.mxu1 %v2151_v38  ;;  %v2221_v38 = vld [vmem:[#allocation7 + $0x234] ss:$52 sps:$4 sm:$0xff]  }
 0x5da   :  { %1229 = vmatpush1.bf16.msra.mxu1 %v2149_v40  ;;  %v2229_v40 = vld [vmem:[#allocation7 + $0x2a0] ss:$52 sps:$4 sm:$0xff]  }
 0x5db   :  { %1230 = vmatprep.subr.bf16.mxu1 %v2157_v41  ;;  %v2227_v41 = vld [vmem:[#allocation7 + $0x29c] ss:$52 sps:$4 sm:$0xff]  }
 0x5de   :  { %1231 = vmatpush1.bf16.msra.mxu1 %v2155_v43  ;;  %v2235_v43 = vld [vmem:[#allocation7 + $0x308] ss:$52 sps:$4 sm:$0xff]  }
 0x5df   :  { %1232 = vmatprep.subr.bf16.mxu1 %v2163_v45  ;;  %v2233_v45 = vld [vmem:[#allocation7 + $0x304] ss:$52 sps:$4 sm:$0xff]  }
 0x5e2   :  { %1233 = vmatpush1.bf16.msra.mxu1 %v2161_v47  ;;  %v2237_v47 = vld [vmem:[#allocation8 + $0xe0] sm:$0xff]  }
 0x5e3   :  { %1234 = vmatprep.subr.bf16.mxu1 %v2169_v49  ;;  %v2239_v49 = vld [vmem:[#allocation8 + $0xa0] sm:$0xff]  }
 0x5e6   :  { %1235 = vmatpush1.bf16.msra.mxu1 %v2167_v51  ;;  %v2241_v51 = vld [vmem:[#allocation8 + $0xe8] sm:$0xff]  }
 0x5e7   :  { %1236 = vmatprep.subr.bf16.mxu1 %v2175_v55  ;;  %v2245_v55 = vld [vmem:[#allocation8 + $0xf0] sm:$0xff]  }
 0x5ea   :  { %1237 = vmatpush1.bf16.msra.mxu1 %v2173_v54  ;;  %v2244_v54 = vld [vmem:[#allocation8 + $0x70] sm:$0xff]  }
 0x5eb   :  { %1238 = vmatprep.subr.bf16.mxu1 %v2181_v57  ;;  %v2247_v57 = vld [vmem:[#allocation8 + $0xb0] sm:$0xff]  }
 0x5ee   :  { %1239 = vmatpush1.bf16.msra.mxu1 %v2179_v59  ;;  %v2249_v59 = vld [vmem:[#allocation8 + $0xf8] sm:$0xff]  }
 0x5ef   :  { %1240 = vmatprep.subr.bf16.mxu1 %v2187_v61  ;;  %v2251_v61 = vld [vmem:[#allocation8 + $0xb8] sm:$0xff]  }
 0x5f2   :  { %1241 = vmatpush1.bf16.msra.mxu1 %v2185_v63  ;;  %v2253_v63 = vld [vmem:[#allocation8 + $0x100] sm:$0xff]  }
 0x5f3   :  { %1308 = vmatprep.subr.bf16.mxu1 %v2193_v2  ;;  %v2255_v2 = vld [vmem:[#allocation8 + $0xc0] sm:$0xff]  }
 0x6a8   :  { %v774_v29 = vpop.f32.mrb[12].mxu1 }
 0x6a9   :  { %v2592_v30 = vadd.f32 %v774_v29, %v2504_v4  ;;  %v2070_v31 = vpop.f32.mrb[13].mxu1  ;;  %v2154_v4 = vld [vmem:[#allocation7 + $0xe8] ss:$52 sps:$4 sm:$0xff]   ;;  %v2209_v29 = vld [vmem:[#allocation7 + $0x164] ss:$52 sps:$4 sm:$0xff]  }
 0x6aa   :  { %v777_v33 = vpop.f32.mrb[14].mxu1  ;;  %1189 = vmatprep.subr.bf16.mxu0 %v2154_v4  ;;  %v2214_v31 = vld [vmem:[#allocation7 + $0x1c8] ss:$52 sps:$4 sm:$0xff]  }
 0x6ab   :  { %v2071_v34 = vpop.f32.mrb[15].mxu1  ;;  %v781_v35 = vmul.f32 %v2592_v30, %v2592_v30  ;;  %1190 = vmatpush1.bf16.msra.mxu0 %v2152_v42  ;;  %v2217_v33 = vld [vmem:[#allocation7 + $0x1d0] ss:$52 sps:$4 sm:$0xff]   ;;  %v2224_v4 = vld [vmem:[#allocation7 + $0x294] ss:$52 sps:$4 sm:$0xff]  }
 0x6ac   :  { %1191 = vmatprep.subr.bf16.mxu0 %v2160_v44  ;;  %v2212_v34 = vld [vmem:[#allocation7 + $0x1c4] ss:$52 sps:$4 sm:$0xff]   ;;  %v2232_v42 = vld [vmem:[#allocation7 + $0x300] ss:$52 sps:$4 sm:$0xff]   ;;  %v2230_v44 = vld [vmem:[#allocation7 + $0x2fc] ss:$52 sps:$4 sm:$0xff]  }
 0x6ad   :  { %785 = vadd.xlane.f32.xlu1 %v781_v35  ;;  %v782_v36 = vmul.f32 %v781_v35, %v2508_v7  ;;  %v2220_v35 = vld [vmem:[#allocation7 + $0x230] ss:$52 sps:$4 sm:$0xff]  }
 0x6af   :  { %783 = vadd.xlane.f32.xlu0 %v782_v36  ;;  %1192 = vmatpush1.bf16.msra.mxu0 %v2158_v46  ;;  %v2223_v36 = vld [vmem:[#allocation7 + $0x238] ss:$52 sps:$4 sm:$0xff]   ;;  %v2236_v46 = vld [vmem:[#allocation8 + $0x60] sm:$0xff]  }
 0x6b0   :  { %1193 = vmatprep.subr.bf16.mxu0 %v2166_v48  ;;  %v2238_v48 = vld [vmem:[#allocation8 + $0x20] sm:$0xff]  }
 0x6b3   :  { %1194 = vmatpush1.bf16.msra.mxu0 %v2164_v50  ;;  %v2240_v50 = vld [vmem:[#allocation8 + $0x68] sm:$0xff]  }
 0x6b4   :  { %1195 = vmatprep.subr.bf16.mxu0 %v2172_v52  ;;  %v2242_v52 = vld [vmem:[#allocation8 + $0x28] sm:$0xff]  }
 0x6b7   :  { %1196 = vmatpush1.bf16.msra.mxu0 %v2170_v53  ;;  %v2243_v53 = vld [vmem:[#allocation8 + $0xa8] sm:$0xff]  }
 0x6b8   :  { %1197 = vmatprep.subr.bf16.mxu0 %v2178_v56  ;;  %v2246_v56 = vld [vmem:[#allocation8 + $0x30] sm:$0xff]  }
 0x6bb   :  { %1198 = vmatpush1.bf16.msra.mxu0 %v2176_v58  ;;  %v2248_v58 = vld [vmem:[#allocation8 + $0x78] sm:$0xff]  }
 0x6bc   :  { %1199 = vmatprep.subr.bf16.mxu0 %v2184_v60  ;;  %v2250_v60 = vld [vmem:[#allocation8 + $0x38] sm:$0xff]  }
 0x6bf   :  { %1200 = vmatpush1.bf16.msra.mxu0 %v2182_v62  ;;  %v2252_v62 = vld [vmem:[#allocation8 + $0x80] sm:$0xff]  }
 0x6c0   :  { %1267 = vmatprep.subr.bf16.mxu0 %v2190_v0  ;;  %v2254_v0 = vld [vmem:[#allocation8 + $0x40] sm:$0xff]  }
 0x73a   :  { %v786_v3 = vpop.xlane.xlu1 %785 }
 0x73c   :  { %v784_v5 = vpop.xlane.xlu0 %783 }
 0x73d   :  { %v787_v6 = vsub.f32 %v786_v3, %v784_v5  ;;  %v788_v8 = vmul.f32 %v784_v5, %v2508_v7  ;;  %v2194_v7 = vld [vmem:[#allocation7 + $0x8c] ss:$52 sps:$4 sm:$0xff]  }
 0x73e   :  { %v2256_v3 = vld [vmem:[#allocation8 + $0x88] sm:$0xff]  }
 0x73f   :  { %v789_v9 = vmul.f32 %v787_v6, %v2512_v14  ;;  %v2197_v14 = vld [vmem:[#allocation7 + $0x94] ss:$52 sps:$4 sm:$0xff]  }
 0x740   :  { %v2257_v5 = vld [vmem:[#allocation8 + $0x108] sm:$0xff]  }
 0x741   :  { %v790_v10 = vadd.f32 %v789_v9, %v788_v8  ;;  %v2258_v6 = vld [vmem:[#allocation8 + $0x48] sm:$0xff]   ;;  %v2260_v9 = vld [vmem:[#allocation8 + $0x90] sm:$0xff]  }
 0x742   :  { %v2259_v8 = vld [vmem:[#allocation8 + $0xc8] sm:$0xff]  }
 0x743   :  { %v791_v11 = vmul.f32 0.015625, %v790_v10  ;;  %v2261_v10 = vld [vmem:[#allocation8 + $0x110] sm:$0xff]  }
 0x745   :  { %v792_v12 = vadd.f32 1e-05, %v791_v11  ;;  %v2262_v11 = vld [vmem:[#allocation8 + $0x50] sm:$0xff]  }
 0x747   :  { %2278 = vrsqrt.f32 %v792_v12  ;;  %v2263_v12 = vld [vmem:[#allocation8 + $0xd0] sm:$0xff]  }
 0x751   :  { %v2279_v13 = vpop.eup %2278 }
 0x752   :  { %v794_v16 = vmul.f32 %v2279_v13, %v2592_v30  ;;  %v2264_v13 = vld [vmem:[#allocation8 + $0x98] sm:$0xff]  }
 0x754   :  { %v799_v17 = vmul.f32 %v1789_v15, %v794_v16  ;;  %v2265_v15 = vld [vmem:[#allocation8 + $0x118] sm:$0xff]  }
 0x755   :  { %v2266_v16 = vld [vmem:[#allocation8 + $0x58] sm:$0xff]  }
 0x756   :  { %v2600_v20 = vpack.c.bf16 %v799_v17, %v799_v17  ;;  %v2267_v17 = vld [vmem:[#allocation8 + $0xd8] sm:$0xff]  }
 0x758   :  { %1218 = vmatmul.mubr.bf16.vlgmr.msra.gmra.mrb[12].mxu0 %v2600_v20  ;;  %1259 = vmatmul.mubr.bf16.vlgmr.msra.gmra.mrb[16].mxu1 %v2600_v20 }
 0x759   :  { %1268 = vmatpush1.bf16.msra.mxu0 %v2188_v18  ;;  %1309 = vmatpush1.bf16.msra.mxu1 %v2191_v19 }
 0x75a   :  { %1269 = vmatprep.subr.bf16.mxu0 %v2196_v21  ;;  %1310 = vmatprep.subr.bf16.mxu1 %v2199_v22 }
 0x75b   :  { %1299 = vmatprep.mubr.bf16.mxu0 %v2425_v32  ;;  %1340 = vmatprep.mubr.bf16.mxu1 %v2425_v32  ;;  %v2215_v32 = vld [vmem:[#allocation7 + $0x1cc] ss:$52 sps:$4 sm:$0xff]  }
 0x75d   :  { %1270 = vmatpush1.bf16.msra.mxu0 %v2194_v7  ;;  %1311 = vmatpush1.bf16.msra.mxu1 %v2197_v14 }
 0x75e   :  { %1271 = vmatprep.subr.bf16.mxu0 %v2202_v23  ;;  %1312 = vmatprep.subr.bf16.mxu1 %v2205_v24 }
 0x761   :  { %1272 = vmatpush1.bf16.msra.mxu0 %v2200_v25  ;;  %1313 = vmatpush1.bf16.msra.mxu1 %v2203_v1 }
 0x762   :  { %1273 = vmatprep.subr.bf16.mxu0 %v2208_v26  ;;  %1314 = vmatprep.subr.bf16.mxu1 %v2211_v27 }
 0x765   :  { %1274 = vmatpush1.bf16.msra.mxu0 %v2206_v28  ;;  %1315 = vmatpush1.bf16.msra.mxu1 %v2209_v29 }
 0x766   :  { %1275 = vmatprep.subr.bf16.mxu0 %v2214_v31  ;;  %1316 = vmatprep.subr.bf16.mxu1 %v2217_v33 }
 0x769   :  { %1276 = vmatpush1.bf16.msra.mxu0 %v2212_v34  ;;  %1317 = vmatpush1.bf16.msra.mxu1 %v2215_v32 }
 0x76a   :  { %1277 = vmatprep.subr.bf16.mxu0 %v2220_v35  ;;  %1318 = vmatprep.subr.bf16.mxu1 %v2223_v36 }
 0x76d   :  { %1278 = vmatpush1.bf16.msra.mxu0 %v2218_v37  ;;  %1319 = vmatpush1.bf16.msra.mxu1 %v2221_v38 }
 0x76e   :  { %1279 = vmatprep.subr.bf16.mxu0 %v2226_v39  ;;  %1320 = vmatprep.subr.bf16.mxu1 %v2229_v40 }
 0x771   :  { %1280 = vmatpush1.bf16.msra.mxu0 %v2224_v4  ;;  %1321 = vmatpush1.bf16.msra.mxu1 %v2227_v41 }
 0x772   :  { %1281 = vmatprep.subr.bf16.mxu0 %v2232_v42  ;;  %1322 = vmatprep.subr.bf16.mxu1 %v2235_v43 }
 0x775   :  { %1282 = vmatpush1.bf16.msra.mxu0 %v2230_v44  ;;  %1323 = vmatpush1.bf16.msra.mxu1 %v2233_v45 }
 0x776   :  { %1932 = vmatprep.subr.bf16.mxu0 %v2236_v46  ;;  %1954 = vmatprep.subr.bf16.mxu1 %v2237_v47 }
 0x778   :  { %1300 = vmatmul.mubr.bf16.vlgmr.msra.gmra.mrb[16].mxu0 %v2600_v20  ;;  %1341 = vmatmul.mubr.bf16.vlgmr.msra.gmra.mrb[20].mxu1 %v2600_v20 }
 0x779   :  { %1933 = vmatpush3.bf16.msra.mxu0 %v2238_v48  ;;  %1955 = vmatpush3.bf16.msra.mxu1 %v2239_v49 }
 0x77a   :  { %1934 = vmatprep.subr.bf16.mxu0 %v2240_v50  ;;  %1956 = vmatprep.subr.bf16.mxu1 %v2241_v51 }
 0x77d   :  { %1935 = vmatpush3.bf16.msra.mxu0 %v2242_v52  ;;  %1957 = vmatpush3.bf16.msra.mxu1 %v2243_v53 }
 0x77e   :  { %1936 = vmatprep.subr.bf16.mxu0 %v2244_v54  ;;  %1958 = vmatprep.subr.bf16.mxu1 %v2245_v55 }
 0x781   :  { %1937 = vmatpush3.bf16.msra.mxu0 %v2246_v56  ;;  %1959 = vmatpush3.bf16.msra.mxu1 %v2247_v57 }
 0x782   :  { %1938 = vmatprep.subr.bf16.mxu0 %v2248_v58  ;;  %1960 = vmatprep.subr.bf16.mxu1 %v2249_v59 }
 0x785   :  { %1939 = vmatpush3.bf16.msra.mxu0 %v2250_v60  ;;  %1961 = vmatpush3.bf16.msra.mxu1 %v2251_v61 }
 0x786   :  { %1940 = vmatprep.subr.bf16.mxu0 %v2252_v62  ;;  %1962 = vmatprep.subr.bf16.mxu1 %v2253_v63 }
 0x789   :  { %1941 = vmatpush3.bf16.msra.mxu0 %v2254_v0  ;;  %1963 = vmatpush3.bf16.msra.mxu1 %v2255_v2 }
 0x78a   :  { %1942 = vmatprep.subr.bf16.mxu0 %v2256_v3  ;;  %1964 = vmatprep.subr.bf16.mxu1 %v2257_v5 }
 0x78d   :  { %1943 = vmatpush3.bf16.msra.mxu0 %v2258_v6  ;;  %1965 = vmatpush3.bf16.msra.mxu1 %v2259_v8 }
 0x78e   :  { %1944 = vmatprep.subr.bf16.mxu0 %v2260_v9  ;;  %1966 = vmatprep.subr.bf16.mxu1 %v2261_v10 }
 0x791   :  { %1945 = vmatpush3.bf16.msra.mxu0 %v2262_v11  ;;  %1967 = vmatpush3.bf16.msra.mxu1 %v2263_v12 }
 0x792   :  { %1946 = vmatprep.subr.bf16.mxu0 %v2264_v13  ;;  %1968 = vmatprep.subr.bf16.mxu1 %v2265_v15 }
 0x795   :  { %1947 = vmatpush3.bf16.msra.mxu0 %v2266_v16  ;;  %1969 = vmatpush3.bf16.msra.mxu1 %v2267_v17 }
 0x82b   :  { %v1219_v18 = vpop.f32.mrb[12].mxu0  ;;  %v1260_v19 = vpop.f32.mrb[16].mxu1 }
 0x82c   :  { %v1854_v20 = vmul.f32 -1.442695, %v1219_v18  ;;  %v1856_v21 = vmul.f32 -1.442695, %v1260_v19  ;;  %v1221_v22 = vpop.f32.mrb[13].mxu0  ;;  %v1262_v7 = vpop.f32.mrb[17].mxu1 }
 0x82d   :  { %v1855_v14 = vmul.f32 -1.442695, %v1221_v22  ;;  %v1857_v23 = vmul.f32 -1.442695, %v1262_v7  ;;  %v1223_v24 = vpop.f32.mrb[14].mxu0  ;;  %v1264_v25 = vpop.f32.mrb[18].mxu1 }
 0x82e   :  { %2280 = vpow2.f32 %v1854_v20  ;;  %v1224_v1 = vpop.f32.mrb[15].mxu0  ;;  %v1265_v26 = vpop.f32.mrb[19].mxu1 }
 0x82f   :  { %2282 = vpow2.f32 %v1856_v21 }
 0x830   :  { %2284 = vpow2.f32 %v1855_v14 }
 0x831   :  { %2286 = vpow2.f32 %v1857_v23 }
 0x838   :  { %v2281_v27 = vpop.eup %2280 }
 0x839   :  { %v2283_v28 = vpop.eup %2282  ;;  %v1361_v29 = vadd.f32 1.0, %v2281_v27 }
 0x83a   :  { %v2285_v31 = vpop.eup %2284  ;;  %v1363_v33 = vadd.f32 1.0, %v2283_v28 }
 0x83b   :  { %v2287_v34 = vpop.eup %2286  ;;  %2288 = vrcp.f32 %v1361_v29  ;;  %v1362_v32 = vadd.f32 1.0, %v2285_v31 }
 0x83c   :  { %2290 = vrcp.f32 %v1363_v33  ;;  %v1364_v35 = vadd.f32 1.0, %v2287_v34 }
 0x83d   :  { %2292 = vrcp.f32 %v1362_v32 }
 0x83e   :  { %2294 = vrcp.f32 %v1364_v35 }
 0x845   :  { %v2289_v36 = vpop.eup %2288 }
 0x846   :  { %v2291_v37 = vpop.eup %2290  ;;  %v1373_v40 = vmul.f32 %v2289_v36, %v1219_v18 }
 0x847   :  { %v2293_v38 = vpop.eup %2292  ;;  %v1375_v4 = vmul.f32 %v2291_v37, %v1260_v19 }
 0x848   :  { %v2295_v39 = vpop.eup %2294  ;;  %v1374_v41 = vmul.f32 %v2293_v38, %v1221_v22 }
 0x849   :  { %v1376_v42 = vmul.f32 %v2295_v39, %v1262_v7 }
 0x84b   :  { %v1301_v43 = vpop.f32.mrb[16].mxu0  ;;  %v1342_v44 = vpop.f32.mrb[20].mxu1 }
 0x84c   :  { %v1377_v45 = vmul.f32 %v1373_v40, %v1301_v43  ;;  %v1379_v46 = vmul.f32 %v1375_v4, %v1342_v44  ;;  %v1303_v47 = vpop.f32.mrb[17].mxu0  ;;  %v1344_v48 = vpop.f32.mrb[21].mxu1 }
 0x84d   :  { %v1378_v49 = vmul.f32 %v1374_v41, %v1303_v47  ;;  %v1380_v50 = vmul.f32 %v1376_v42, %v1344_v48  ;;  %v1305_v51 = vpop.f32.mrb[18].mxu0  ;;  %v1346_v52 = vpop.f32.mrb[22].mxu1 }
 0x84e   :  { %v1306_v53 = vpop.f32.mrb[19].mxu0  ;;  %v1347_v54 = vpop.f32.mrb[23].mxu1  ;;  %v1381_v57 = vpack.c.bf16 %v1377_v45, %v1377_v45  ;;  %v1383_v58 = vpack.c.bf16 %v1379_v46, %v1379_v46 }
 0x84f   :  { %v1382_v55 = vpack.c.bf16 %v1378_v49, %v1378_v49  ;;  %v1384_v56 = vpack.c.bf16 %v1380_v50, %v1380_v50 }
 0x851   :  { %1673 = vmatprep.mubr.bf16.mxu0 %v1382_v55  ;;  %1713 = vmatprep.mubr.bf16.mxu1 %v1384_v56 }
 0x852   :  { %1674 = vmatmul.mubr.bf16.vlgmr.msra.gmra.mrb[20].mxu0 %v1381_v57  ;;  %1714 = vmatmul.mubr.bf16.vlgmr.msra.gmra.mrb[24].mxu1 %v1383_v58 }
 0x925   :  { %v1948_v59 = vpop.f32.mrb[20].mxu0  ;;  %v1970_v60 = vpop.f32.mrb[24].mxu1 }
 0x926   :  { %v1949_v61 = vpop.f32.mrb[21].mxu0  ;;  %v1971_v62 = vpop.f32.mrb[25].mxu1 }
 0x927   :  { %v1950_v63 = vadd.f32 %v1949_v61, %v1948_v59  ;;  %v1972_v0 = vadd.f32 %v1971_v62, %v1970_v60  ;;  %v1951_v2 = vpop.f32.mrb[22].mxu0  ;;  %v1973_v3 = vpop.f32.mrb[26].mxu1 }
 0x928   :  { %v1952_v5 = vpop.f32.mrb[23].mxu0  ;;  %v1974_v6 = vpop.f32.mrb[27].mxu1 }
 0x929   :  { %v1716_v8 = vadd.f32 %v1972_v0, %v1950_v63 }
 0x92b   :  { %v1721_v9 = vadd.f32 %v1716_v8, %v2592_v30 }
 0x92d   :  { %1722 = vst [vmem:[#allocation10] sm:$0xff] %v1721_v9 }
 0x92e   :  { %2395 = shalt.err (!%p2392_p8)
}
 0x92f   :  { %s2396_s19 = scalar_lea.hbm %s2625_s4, 128 }
 0x930   :  { %p2397_p9 = scmp.ne.s32.totalorder %s2625_s4, %s2396_s19  ;;  %p2400_p10 = scmp.lt.u32.totalorder %s2396_s19, %s2625_s4 }
 0x932   :  { %p2402_p11 = pnand %p2400_p10, %p2397_p9 }
 0x934   :  { %2405 = shalt.err (!%p2402_p11)
}
 0x935   :  { %1732 = dma.vmem_to_hbm [thread:$0]  %s1730_s15, 128, %s2625_s4, [#allocation4]  }
 0x936   :  { %2412 = dma.done.wait [#allocation4], 128  }
 0x937   :  { %2413 = vsyncadd [#allocation4], 4294967168 }
 0x938   :  { %1736 = vsyncpa [#allocation3], 1 }
 0x939   :  { %1737 = vsyncpa [#allocation6], 1 }
 0x93a   :  { %1738 = vsyncpa [#allocation9], 1 }
 0x93b   :  { %1739 = vsyncpa [#allocation4], 1 }

</bundles_post_ra>
